<compile_context>
chip_gen: v6e
topology: v6e:2x2x1
jax: 0.10.0
libtpu: 0.0.40
codegen_flags: <defaults>
</compile_context>

<pallas_src>
import functools
import math

import numpy as np
import jax
import jax.numpy as jnp
from jax.experimental import pallas as pl
from jax.experimental.pallas import tpu as pltpu

# dtype fed to the MXU (f32 accumulation everywhere via preferred_element_type)
_MM_DTYPE = jnp.bfloat16

# Row-tile targets (multiples of 8).
_LN_ROW_TILE = 512
_MLP_ROW_TILE = 256
_ATTN_ROW_TARGET = 512     # target rows (= windows * N) per attention grid step


def _row_tile(R, target):
    # Full array if small, otherwise a multiple-of-8 tile; ragged last blocks
    # are handled by Pallas (rowwise ops, so padding rows are harmless).
    return R if R <= target else target


def _pick_wchunk(nW, N, target_rows=_ATTN_ROW_TARGET):
    """Largest divisor of nW whose chunk (d*N rows) fits the row target and
    satisfies the sublane rule (d*N % 8 == 0 unless it is the full extent)."""
    if nW * N <= target_rows:
        return nW
    best = None
    for d in range(1, nW):
        if nW % d == 0 and d * N <= target_rows and (d * N) % 8 == 0:
            best = d
    return best if best is not None else nW


def _compiler_params(est_vmem_bytes, semantics):
    kwargs = dict(dimension_semantics=semantics)
    # Only lift the scoped-VMEM limit when the working set actually needs it
    # (keeps the common/small case at compiler defaults on every TPU gen).
    if est_vmem_bytes > 24 * 1024 * 1024:
        kwargs["vmem_limit_bytes"] = int(min(100 * 1024 * 1024,
                                             est_vmem_bytes * 3 // 2))
    return pltpu.CompilerParams(**kwargs)


_CONST = dict(pipeline_mode=pl.Buffered(1))   # single-buffer constant operands


# ----------------------------- LayerNorm kernel -----------------------------
# Only used on the fallback path (spatial padding needed); the common path has
# LN1 fused into the attention kernel.

def _ln_kernel(x_ref, g_ref, b_ref, o_ref):
    x = x_ref[...].astype(jnp.float32)
    mu = jnp.mean(x, axis=-1, keepdims=True)
    var = jnp.mean(jnp.square(x - mu), axis=-1, keepdims=True)
    y = (x - mu) * jax.lax.rsqrt(var + 1e-5)
    y = y * g_ref[...].astype(jnp.float32) + b_ref[...].astype(jnp.float32)
    o_ref[...] = y.astype(o_ref.dtype)


def layernorm(x2d, gamma, beta, out_dtype=None):
    R, C = x2d.shape
    out_dtype = x2d.dtype if out_dtype is None else out_dtype
    TR = _row_tile(R, _LN_ROW_TILE)
    return pl.pallas_call(
        _ln_kernel,
        out_shape=jax.ShapeDtypeStruct((R, C), out_dtype),
        grid=(pl.cdiv(R, TR),),
        in_specs=[
            pl.BlockSpec((TR, C), lambda i: (i, 0)),
            pl.BlockSpec((1, C), lambda i: (0, 0), **_CONST),
            pl.BlockSpec((1, C), lambda i: (0, 0), **_CONST),
        ],
        out_specs=pl.BlockSpec((TR, C), lambda i: (i, 0)),
        compiler_params=_compiler_params(0, ("parallel",)),
    )(x2d, gamma.reshape(1, C), beta.reshape(1, C))


# ------------------ fused residual-add + LN2 + MLP + residual ----------------

def _add_ln_mlp_kernel(s_ref, a_ref, g_ref, b_ref, w1_ref, b1_ref, w2_ref,
                       b2_ref, o_ref):
    # x = shortcut + attention-branch output (first residual fused in)
    x = s_ref[...].astype(jnp.float32) + a_ref[...].astype(jnp.float32)
    mu = jnp.mean(x, axis=-1, keepdims=True)
    var = jnp.mean(jnp.square(x - mu), axis=-1, keepdims=True)
    xn = (x - mu) * jax.lax.rsqrt(var + 1e-5)
    xn = xn * g_ref[...].astype(jnp.float32) + b_ref[...].astype(jnp.float32)

    # weights arrive pre-cast to bf16 from the wrapper
    h = jnp.dot(xn.astype(_MM_DTYPE), w1_ref[...],
                preferred_element_type=jnp.float32)
    h = h + b1_ref[...].astype(jnp.float32)
    # exact GELU (erf form), matching torch.nn.GELU default
    h = 0.5 * h * (1.0 + jax.lax.erf(h * 0.7071067811865476))
    y = jnp.dot(h.astype(_MM_DTYPE), w2_ref[...],
                preferred_element_type=jnp.float32)
    y = y + b2_ref[...].astype(jnp.float32)
    o_ref[...] = (x + y).astype(o_ref.dtype)                # second residual


def add_ln_mlp_residual(short2d, attn2d, gamma, beta, w1, b1, w2, b2):
    R, C = short2d.shape
    Ch = w1.shape[1]
    TR = _row_tile(R, _MLP_ROW_TILE)
    est = (3 * 2 * TR * C * 4            # shortcut/attn/out f32 tiles, 2x buf
           + TR * Ch * 4                 # f32 hidden
           + 2 * (C * Ch + Ch * C)       # resident bf16 weights (single buf)
           + (3 * C + Ch) * 4)           # biases / LN params
    return pl.pallas_call(
        _add_ln_mlp_kernel,
        out_shape=jax.ShapeDtypeStruct((R, C), short2d.dtype),
        grid=(pl.cdiv(R, TR),),
        in_specs=[
            pl.BlockSpec((TR, C), lambda i: (i, 0)),
            pl.BlockSpec((TR, C), lambda i: (i, 0)),
            pl.BlockSpec((1, C), lambda i: (0, 0), **_CONST),
            pl.BlockSpec((1, C), lambda i: (0, 0), **_CONST),
            pl.BlockSpec((C, Ch), lambda i: (0, 0), **_CONST),   # resident bf16
            pl.BlockSpec((1, Ch), lambda i: (0, 0), **_CONST),
            pl.BlockSpec((Ch, C), lambda i: (0, 0), **_CONST),
            pl.BlockSpec((1, C), lambda i: (0, 0), **_CONST),
        ],
        out_specs=pl.BlockSpec((TR, C), lambda i: (i, 0)),
        compiler_params=_compiler_params(est, ("parallel",)),
    )(short2d, attn2d, gamma.reshape(1, C), beta.reshape(1, C),
      w1, b1.reshape(1, Ch), w2, b2.reshape(1, C))


# ------------------------- windowed attention kernel -------------------------

def _attn_core(x16, bias_ref, qkvw_ref, qkvb_ref, projw_ref, projb_ref, o_ref,
               *, num_heads, head_dim, wchunk, N, C):
    # One batched QKV matmul and one batched output projection per chunk of
    # windows; per-head scores are window-batched einsums.
    qkv = jnp.dot(x16, qkvw_ref[...], preferred_element_type=jnp.float32)
    qkv = qkv + qkvb_ref[...].astype(jnp.float32)            # (rows, 3C), f32
    qkv16 = qkv.astype(_MM_DTYPE)          # single cast; head slices in bf16

    outs = []
    for h in range(num_heads):
        lo = h * head_dim
        q = qkv16[:, lo:lo + head_dim].reshape(wchunk, N, head_dim)
        k = qkv16[:, C + lo:C + lo + head_dim].reshape(wchunk, N, head_dim)
        v = qkv16[:, 2 * C + lo:2 * C + lo + head_dim].reshape(wchunk, N, head_dim)
        # qk scale is pre-folded into the q columns of qkv_w / qkv_b.
        s = jnp.einsum('wnd,wmd->wnm', q, k,
                       preferred_element_type=jnp.float32)    # (wchunk, N, N)
        # rel-pos bias (+ shift mask, pre-combined in the wrapper): single add;
        # shape (1, N, N) or (wchunk, N, N) broadcasts over windows.
        s = s + bias_ref[h].astype(jnp.float32)
        s = s - jnp.max(s, axis=-1, keepdims=True)
        p = jnp.exp(s)
        p = p * pl.reciprocal(jnp.sum(p, axis=-1, keepdims=True), approx=True)
        o = jnp.einsum('wnm,wmd->wnd', p.astype(_MM_DTYPE), v,
                       preferred_element_type=jnp.float32)
        outs.append(o.astype(_MM_DTYPE))                      # bf16 before concat

    out = jnp.concatenate(outs, axis=-1).reshape(wchunk * N, C)
    y = jnp.dot(out, projw_ref[...], preferred_element_type=jnp.float32)
    y = y + projb_ref[...].astype(jnp.float32)
    # TODO(synk): for C < 128, a lane-dense repack of the out_spec (wrapper-side
    # reshape to a (.., 128) slab) would avoid masked vst.msk partial stores.
    o_ref[0] = y.astype(o_ref.dtype)


def _attn_kernel_ln(x_ref, g_ref, b_ref, bias_ref, qkvw_ref, qkvb_ref,
                    projw_ref, projb_ref, o_ref, **kw):
    # LN1 fused: normalize the (pre-LN) chunk in f32, then feed the MXU in bf16.
    x = x_ref[0].astype(jnp.float32)
    mu = jnp.mean(x, axis=-1, keepdims=True)
    var = jnp.mean(jnp.square(x - mu), axis=-1, keepdims=True)
    xn = (x - mu) * jax.lax.rsqrt(var + 1e-5)
    xn = xn * g_ref[...].astype(jnp.float32) + b_ref[...].astype(jnp.float32)
    _attn_core(xn.astype(_MM_DTYPE), bias_ref, qkvw_ref, qkvb_ref,
               projw_ref, projb_ref, o_ref, **kw)


def _attn_kernel_noln(x_ref, bias_ref, qkvw_ref, qkvb_ref, projw_ref,
                      projb_ref, o_ref, **kw):
    _attn_core(x_ref[0].astype(_MM_DTYPE), bias_ref, qkvw_ref, qkvb_ref,
               projw_ref, projb_ref, o_ref, **kw)


def window_attention(xw, bias, qkv_w, qkv_b, proj_w, proj_b, num_heads, nW, N,
                     ln=None):
    """xw: (B, nW*N, C) tokens in window order (pre-LN if `ln` is given,
    otherwise already normalized); bias: (heads, 1 or nW, N, N) = rel-pos bias
    (+ shift mask pre-combined); qkv_w/proj_w pre-cast bf16; ln=(gamma, beta)
    fuses the pre-attention LayerNorm into the kernel."""
    Bimg, WN, C = xw.shape
    head_dim = C // num_heads
    wchunk = _pick_wchunk(nW, N)
    n_chunks = nW // wchunk
    rows = wchunk * N
    nWb = bias.shape[1]                   # 1 (no shift) or nW (shifted)

    kw = dict(num_heads=num_heads, head_dim=head_dim, wchunk=wchunk, N=N, C=C)
    kernel = functools.partial(
        _attn_kernel_ln if ln is not None else _attn_kernel_noln, **kw)

    in_specs = [pl.BlockSpec((1, rows, C), lambda b, w: (b, w, 0))]
    args = [xw]
    if ln is not None:
        g, bt = ln
        in_specs += [pl.BlockSpec((1, C), lambda b, w: (0, 0), **_CONST),
                     pl.BlockSpec((1, C), lambda b, w: (0, 0), **_CONST)]
        args += [g.reshape(1, C), bt.reshape(1, C)]
    if nWb == 1:
        in_specs.append(pl.BlockSpec((num_heads, 1, N, N),
                                     lambda b, w: (0, 0, 0, 0), **_CONST))
    else:
        in_specs.append(pl.BlockSpec((num_heads, wchunk, N, N),
                                     lambda b, w: (0, w, 0, 0)))
    args.append(bias)
    in_specs += [
        pl.BlockSpec((C, 3 * C), lambda b, w: (0, 0), **_CONST),   # bf16, resident
        pl.BlockSpec((1, 3 * C), lambda b, w: (0, 0), **_CONST),
        pl.BlockSpec((C, C), lambda b, w: (0, 0), **_CONST),       # bf16, resident
        pl.BlockSpec((1, C), lambda b, w: (0, 0), **_CONST),
    ]
    args += [qkv_w, qkv_b.reshape(1, -1), proj_w, proj_b.reshape(1, -1)]

    bytes_per_x = 4 if xw.dtype == jnp.float32 else 2
    est = (2 * 2 * rows * C * bytes_per_x          # x in + out, double-buffered
           + rows * 3 * C * 6                      # f32 qkv + bf16 copy
           + 4 * wchunk * N * N * 4                # live score/prob tiles
           + 2 * (3 * C * C + C * C)               # resident bf16 weights
           + num_heads * min(nWb, 2 * wchunk) * N * N * 4
           + rows * C * 6)                         # concat + proj result

    return pl.pallas_call(
        kernel,
        out_shape=jax.ShapeDtypeStruct((Bimg, WN, C), jnp.float32),
        grid=(Bimg, n_chunks),
        in_specs=in_specs,
        out_specs=pl.BlockSpec((1, rows, C), lambda b, w: (b, w, 0)),
        compiler_params=_compiler_params(est, ("parallel", "parallel")),
    )(*args)


# ------------------------------- glue (JAX) ---------------------------------
# TODO(synk): window partition/reverse (+ pad/roll) could be folded into the
# attention kernel's index_maps (row-strip blocks + in-VMEM regrouping) to
# remove the XLA transpose round trips; kept in JAX here for robustness.

def window_partition(x, ws):
    B, H, W, C = x.shape
    x = x.reshape(B, H // ws, ws, W // ws, ws, C)
    return x.transpose(0, 1, 3, 2, 4, 5).reshape(-1, ws, ws, C)


def window_reverse(windows, ws, H, W):
    B = windows.shape[0] // (H * W // ws // ws)
    x = windows.reshape(B, H // ws, W // ws, ws, ws, -1)
    return x.transpose(0, 1, 3, 2, 4, 5).reshape(B, H, W, -1)


def relative_position_index(ws):
    coords = np.stack(np.meshgrid(np.arange(ws), np.arange(ws), indexing="ij"))
    coords_flatten = coords.reshape(2, -1)
    rel = coords_flatten[:, :, None] - coords_flatten[:, None, :]
    rel = rel.transpose(1, 2, 0).copy()
    rel[:, :, 0] += ws - 1
    rel[:, :, 1] += ws - 1
    rel[:, :, 0] *= 2 * ws - 1
    return rel.sum(-1)  # (N, N)


def compute_attn_mask(Hp, Wp, ws, ss):
    img_mask = np.zeros((1, Hp, Wp, 1), dtype=np.float32)
    h_slices = (slice(0, -ws), slice(-ws, -ss), slice(-ss, None))
    w_slices = (slice(0, -ws), slice(-ws, -ss), slice(-ss, None))
    cnt = 0
    for h in h_slices:
        for w in w_slices:
            img_mask[:, h, w, :] = cnt
            cnt += 1
    m = img_mask.reshape(1, Hp // ws, ws, Wp // ws, ws, 1)
    m = m.transpose(0, 1, 3, 2, 4, 5).reshape(-1, ws * ws)
    am = m[:, None, :] - m[:, :, None]
    am = np.where(am != 0, -100.0, 0.0).astype(np.float32)
    return jnp.asarray(am)  # (nW, N, N)


def _prepare_block(p, ws, num_heads, dim, shift_size, attn_mask):
    """Per-block prep: fold the qk scale into the qkv weights, pre-cast all
    matmul weights to bf16, build the (heads, 1|nW, N, N) combined rel-pos-bias
    (+ shift mask) tensor so the kernel does a single bias add."""
    head_dim = dim // num_heads
    scale = head_dim ** (-0.5)
    N = ws * ws
    rel_idx = relative_position_index(ws).reshape(-1)
    rel_bias = p["rel_table"][rel_idx].reshape(N, N, num_heads).transpose(2, 0, 1)
    if shift_size > 0:
        bias = rel_bias[:, None, :, :] + attn_mask[None, :, :, :]   # (H, nW, N, N)
    else:
        bias = rel_bias[:, None, :, :]                              # (H, 1, N, N)
    col_scale = jnp.concatenate([
        jnp.full((dim,), scale, jnp.float32),
        jnp.ones((2 * dim,), jnp.float32)])
    p2 = dict(p)
    p2["attn_bias"] = bias.astype(jnp.float32)
    p2["qkv_w16"] = (p["qkv_w"] * col_scale[None, :]).astype(_MM_DTYPE)
    p2["qkv_b_s"] = p["qkv_b"] * col_scale
    p2["proj_w16"] = p["proj_w"].astype(_MM_DTYPE)
    p2["fc1_w16"] = p["fc1_w"].astype(_MM_DTYPE)
    p2["fc2_w16"] = p["fc2_w"].astype(_MM_DTYPE)
    return p2


def swin_block(x, H, W, p, ws, shift_size, num_heads):
    B, L, C = x.shape
    N = ws * ws
    shortcut = x

    pad_r = (ws - W % ws) % ws
    pad_b = (ws - H % ws) % ws
    needs_pad = pad_r > 0 or pad_b > 0

    if needs_pad:
        # Fallback: padded tokens must be exact zeros after norm1 (PyTorch pads
        # post-norm), so LN1 cannot be fused into the attention kernel here.
        xn = layernorm(x.reshape(B * L, C), p["ln1_g"], p["ln1_b"],
                       out_dtype=_MM_DTYPE).reshape(B, H, W, C)
        xn = jnp.pad(xn, ((0, 0), (0, pad_b), (0, pad_r), (0, 0)))
        fuse_ln = False
    else:
        xn = x.reshape(B, H, W, C)       # LN1 fused into the attention kernel
        fuse_ln = True

    Hp, Wp = H + pad_b, W + pad_r
    nW = (Hp // ws) * (Wp // ws)

    if shift_size > 0:
        shifted = jnp.roll(xn, shift=(-shift_size, -shift_size), axis=(1, 2))
    else:
        shifted = xn

    # All nW windows of an image are contiguous after window_partition.
    xw = window_partition(shifted, ws).reshape(B, nW * N, C)

    attn_out = window_attention(
        xw, p["attn_bias"], p["qkv_w16"], p["qkv_b_s"], p["proj_w16"],
        p["proj_b"], num_heads, nW, N,
        ln=(p["ln1_g"], p["ln1_b"]) if fuse_ln else None)

    attn_out = attn_out.reshape(-1, ws, ws, C)
    shifted = window_reverse(attn_out, ws, Hp, Wp)

    if shift_size > 0:
        xr = jnp.roll(shifted, shift=(shift_size, shift_size), axis=(1, 2))
    else:
        xr = shifted
    if needs_pad:
        xr = xr[:, :H, :W, :]
    xr = xr.reshape(B * L, C)

    # fused: first residual add + LN2 + MLP + second residual, one HBM pass
    x = add_ln_mlp_residual(shortcut.reshape(B * L, C), xr,
                            p["ln2_g"], p["ln2_b"],
                            p["fc1_w16"], p["fc1_b"], p["fc2_w16"], p["fc2_b"])
    return x.reshape(B, L, C)


def basic_layer_forward(x, H, W, params, ws, num_heads):
    B, L, C = x.shape
    shift = ws // 2
    Hp = int(math.ceil(H / ws)) * ws
    Wp = int(math.ceil(W / ws)) * ws
    attn_mask = compute_attn_mask(Hp, Wp, ws, shift)
    for i, p in enumerate(params["blocks"]):
        ss = 0 if i % 2 == 0 else shift
        pb = _prepare_block(p, ws, num_heads, C, ss, attn_mask)
        x = swin_block(x, H, W, pb, ws, ss, num_heads)
    # downsample=None -> return (x, H, W, x, H, W)
    return x, H, W, x, H, W


# ----------------------------- param creation -------------------------------

def make_params(key, dim, depth, num_heads, ws, mlp_ratio):
    hidden = int(dim * mlp_ratio)
    blocks = []
    for i in range(depth):
        keys = jax.random.split(jax.random.fold_in(key, i), 6)
        blk = {
            "ln1_g": jnp.ones((dim,), jnp.float32),
            "ln1_b": jnp.zeros((dim,), jnp.float32),
            "qkv_w": jax.random.normal(keys[0], (dim, 3 * dim), jnp.float32) * 0.02,
            "qkv_b": jnp.zeros((3 * dim,), jnp.float32),
            "proj_w": jax.random.normal(keys[1], (dim, dim), jnp.float32) * 0.02,
            "proj_b": jnp.zeros((dim,), jnp.float32),
            "rel_table": jax.random.normal(
                keys[2], ((2 * ws - 1) * (2 * ws - 1), num_heads), jnp.float32) * 0.02,
            "ln2_g": jnp.ones((dim,), jnp.float32),
            "ln2_b": jnp.zeros((dim,), jnp.float32),
            "fc1_w": jax.random.normal(keys[3], (dim, hidden), jnp.float32) * 0.02,
            "fc1_b": jnp.zeros((hidden,), jnp.float32),
            "fc2_w": jax.random.normal(keys[4], (hidden, dim), jnp.float32) * 0.02,
            "fc2_b": jnp.zeros((dim,), jnp.float32),
        }
        blocks.append(blk)
    return {"blocks": blocks}


# ---------------------------------- main -------------------------------------

if __name__ == "__main__":
    B, H, W, C = 2, 8, 8, 32
    depth, num_heads, ws, mlp_ratio = 2, 2, 4, 2.0

    key = jax.random.PRNGKey(0)
    kx, kp = jax.random.split(key)
    x = jax.random.normal(kx, (B, H * W, C), jnp.float32)
    params = make_params(kp, C, depth, num_heads, ws, mlp_ratio)

    out, Ho, Wo, out_down, Wh, Ww = basic_layer_forward(x, H, W, params, ws, num_heads)
    jax.block_until_ready(out)
    jax.block_until_ready(out_down)
    assert out.shape == (B, H * W, C) and (Ho, Wo) == (H, W) and (Wh, Ww) == (H, W)
    assert bool(jnp.all(jnp.isfinite(out)))
    print("KERNEL_OK")
</pallas_src>

<mosaic_0001>
module attributes {stable_mosaic.version = 11 : i64} {
  func.func @_attn_kernel_ln(%arg0: i32, %arg1: i32, %arg2: memref<1x64x32xf32, #tpu.memory_space<vmem>>, %arg3: memref<1x32xf32, #tpu.memory_space<vmem>>, %arg4: memref<1x32xf32, #tpu.memory_space<vmem>>, %arg5: memref<2x1x16x16xf32, #tpu.memory_space<vmem>>, %arg6: memref<32x96xbf16, #tpu.memory_space<vmem>>, %arg7: memref<1x96xf32, #tpu.memory_space<vmem>>, %arg8: memref<32x32xbf16, #tpu.memory_space<vmem>>, %arg9: memref<1x32xf32, #tpu.memory_space<vmem>>, %arg10: memref<1x64x32xf32, #tpu.memory_space<vmem>>) attributes {dimension_semantics = [#tpu.dimension_semantics<parallel>, #tpu.dimension_semantics<parallel>], iteration_bounds = array<i64: 2, 1>, scalar_prefetch = 0 : i64, scratch_operands = 0 : i64, tpu.core_type = #tpu.core_type<tc>, window_params = [{transform_indices = @transform_0, window_bounds = array<i64: 1, 64, 32>}, {pipeline_mode = #tpu.pipeline_mode<synchronous>, transform_indices = @transform_1, window_bounds = array<i64: 1, 32>}, {pipeline_mode = #tpu.pipeline_mode<synchronous>, transform_indices = @transform_2, window_bounds = array<i64: 1, 32>}, {pipeline_mode = #tpu.pipeline_mode<synchronous>, transform_indices = @transform_3, window_bounds = array<i64: 2, 1, 16, 16>}, {pipeline_mode = #tpu.pipeline_mode<synchronous>, transform_indices = @transform_4, window_bounds = array<i64: 32, 96>}, {pipeline_mode = #tpu.pipeline_mode<synchronous>, transform_indices = @transform_5, window_bounds = array<i64: 1, 96>}, {pipeline_mode = #tpu.pipeline_mode<synchronous>, transform_indices = @transform_6, window_bounds = array<i64: 32, 32>}, {pipeline_mode = #tpu.pipeline_mode<synchronous>, transform_indices = @transform_7, window_bounds = array<i64: 1, 32>}, {transform_indices = @transform_8, window_bounds = array<i64: 1, 64, 32>}]} {
    %c0 = arith.constant 0 : index
    %c0_0 = arith.constant 0 : index
    %c0_1 = arith.constant 0 : index
    %0 = vector.load %arg2[%c0, %c0_0, %c0_1] : memref<1x64x32xf32, #tpu.memory_space<vmem>>, vector<1x64x32xf32>
    %1 = vector.shape_cast %0 : vector<1x64x32xf32> to vector<64x32xf32>
    %cst = arith.constant dense<0.000000e+00> : vector<64xf32>
    %2 = vector.multi_reduction <add>, %1, %cst [1] : vector<64x32xf32> to vector<64xf32>
    %3 = vector.shape_cast %2 : vector<64xf32> to vector<64x1xf32>
    %cst_2 = arith.constant 3.200000e+01 : f32
    %4 = vector.broadcast %cst_2 : f32 to vector<64x1xf32>
    %5 = arith.divf %3, %4 : vector<64x1xf32>
    %6 = vector.broadcast %5 : vector<64x1xf32> to vector<64x32xf32>
    %7 = arith.subf %1, %6 : vector<64x32xf32>
    %8 = arith.mulf %7, %7 : vector<64x32xf32>
    %cst_3 = arith.constant dense<0.000000e+00> : vector<64xf32>
    %9 = vector.multi_reduction <add>, %8, %cst_3 [1] : vector<64x32xf32> to vector<64xf32>
    %10 = vector.shape_cast %9 : vector<64xf32> to vector<64x1xf32>
    %cst_4 = arith.constant 3.200000e+01 : f32
    %11 = vector.broadcast %cst_4 : f32 to vector<64x1xf32>
    %12 = arith.divf %10, %11 : vector<64x1xf32>
    %13 = vector.broadcast %5 : vector<64x1xf32> to vector<64x32xf32>
    %14 = arith.subf %1, %13 : vector<64x32xf32>
    %cst_5 = arith.constant 9.99999974E-6 : f32
    %15 = vector.broadcast %cst_5 : f32 to vector<64x1xf32>
    %16 = arith.addf %12, %15 : vector<64x1xf32>
    %17 = math.rsqrt %16 : vector<64x1xf32>
    %18 = vector.broadcast %17 : vector<64x1xf32> to vector<64x32xf32>
    %19 = arith.mulf %14, %18 : vector<64x32xf32>
    %c0_6 = arith.constant 0 : index
    %c0_7 = arith.constant 0 : index
    %20 = vector.load %arg3[%c0_6, %c0_7] : memref<1x32xf32, #tpu.memory_space<vmem>>, vector<1x32xf32>
    %21 = vector.broadcast %20 : vector<1x32xf32> to vector<64x32xf32>
    %22 = arith.mulf %19, %21 : vector<64x32xf32>
    %c0_8 = arith.constant 0 : index
    %c0_9 = arith.constant 0 : index
    %23 = vector.load %arg4[%c0_8, %c0_9] : memref<1x32xf32, #tpu.memory_space<vmem>>, vector<1x32xf32>
    %24 = vector.broadcast %23 : vector<1x32xf32> to vector<64x32xf32>
    %25 = arith.addf %22, %24 : vector<64x32xf32>
    %26 = arith.truncf %25 : vector<64x32xf32> to vector<64x32xbf16>
    %c0_10 = arith.constant 0 : index
    %c0_11 = arith.constant 0 : index
    %27 = vector.load %arg6[%c0_10, %c0_11] : memref<32x96xbf16, #tpu.memory_space<vmem>>, vector<32x96xbf16>
    %cst_12 = arith.constant dense<0.000000e+00> : vector<64x96xf32>
    %28 = tpu.matmul %26, %27, %cst_12 {dimension_numbers = #tpu.dot_dimension_numbers<[1], [0], [0], [1], [0, 0, 1, 1], [], []>} : vector<64x32xbf16>, vector<32x96xbf16>, vector<64x96xf32> -> vector<64x96xf32>
    %c0_13 = arith.constant 0 : index
    %c0_14 = arith.constant 0 : index
    %29 = vector.load %arg7[%c0_13, %c0_14] : memref<1x96xf32, #tpu.memory_space<vmem>>, vector<1x96xf32>
    %30 = vector.broadcast %29 : vector<1x96xf32> to vector<64x96xf32>
    %31 = arith.addf %28, %30 : vector<64x96xf32>
    %32 = arith.truncf %31 : vector<64x96xf32> to vector<64x96xbf16>
    %33 = vector.extract_strided_slice %32 {offsets = [0, 0], sizes = [64, 16], strides = [1, 1]} : vector<64x96xbf16> to vector<64x16xbf16>
    %34 = vector.shape_cast %33 : vector<64x16xbf16> to vector<4x16x16xbf16>
    %35 = vector.extract_strided_slice %32 {offsets = [0, 32], sizes = [64, 16], strides = [1, 1]} : vector<64x96xbf16> to vector<64x16xbf16>
    %36 = vector.shape_cast %35 : vector<64x16xbf16> to vector<4x16x16xbf16>
    %37 = vector.extract_strided_slice %32 {offsets = [0, 64], sizes = [64, 16], strides = [1, 1]} : vector<64x96xbf16> to vector<64x16xbf16>
    %38 = vector.shape_cast %37 : vector<64x16xbf16> to vector<4x16x16xbf16>
    "tpu.trace_start"() <{level = 10 : i32, message = "wnd,wmd->wnm"}> : () -> ()
    %cst_15 = arith.constant dense<0.000000e+00> : vector<4x16x16xf32>
    %39 = tpu.matmul %34, %36, %cst_15 {dimension_numbers = #tpu.dot_dimension_numbers<[2], [2], [1], [1], [0, 0, 0, 1, 1, 1], [0], [0]>} : vector<4x16x16xbf16>, vector<4x16x16xbf16>, vector<4x16x16xf32> -> vector<4x16x16xf32>
    "tpu.trace_stop"() : () -> ()
    %c0_16 = arith.constant 0 : index
    %c0_17 = arith.constant 0 : index
    %c0_18 = arith.constant 0 : index
    %c0_19 = arith.constant 0 : index
    %40 = vector.load %arg5[%c0_16, %c0_17, %c0_18, %c0_19] : memref<2x1x16x16xf32, #tpu.memory_space<vmem>>, vector<1x1x16x16xf32>
    %41 = vector.shape_cast %40 : vector<1x1x16x16xf32> to vector<1x16x16xf32>
    %42 = vector.broadcast %41 : vector<1x16x16xf32> to vector<4x16x16xf32>
    %43 = arith.addf %39, %42 : vector<4x16x16xf32>
    %cst_20 = arith.constant dense<0xFF800000> : vector<4x16xf32>
    %44 = vector.multi_reduction <maximumf>, %43, %cst_20 [2] : vector<4x16x16xf32> to vector<4x16xf32>
    %45 = vector.shape_cast %44 : vector<4x16xf32> to vector<4x16x1xf32>
    %46 = vector.broadcast %45 : vector<4x16x1xf32> to vector<4x16x16xf32>
    %47 = arith.subf %43, %46 : vector<4x16x16xf32>
    %48 = math.exp %47 : vector<4x16x16xf32>
    %cst_21 = arith.constant dense<0.000000e+00> : vector<4x16xf32>
    %49 = vector.multi_reduction <add>, %48, %cst_21 [2] : vector<4x16x16xf32> to vector<4x16xf32>
    %50 = vector.shape_cast %49 : vector<4x16xf32> to vector<4x16x1xf32>
    %51 = tpu.reciprocal %50 {approx = true} : vector<4x16x1xf32> -> vector<4x16x1xf32>
    %52 = vector.broadcast %51 : vector<4x16x1xf32> to vector<4x16x16xf32>
    %53 = arith.mulf %48, %52 : vector<4x16x16xf32>
    %54 = arith.truncf %53 : vector<4x16x16xf32> to vector<4x16x16xbf16>
    "tpu.trace_start"() <{level = 10 : i32, message = "wnm,wmd->wnd"}> : () -> ()
    %cst_22 = arith.constant dense<0.000000e+00> : vector<4x16x16xf32>
    %55 = tpu.matmul %54, %38, %cst_22 {dimension_numbers = #tpu.dot_dimension_numbers<[2], [1], [1], [2], [0, 0, 0, 1, 1, 2], [0], [0]>} : vector<4x16x16xbf16>, vector<4x16x16xbf16>, vector<4x16x16xf32> -> vector<4x16x16xf32>
    "tpu.trace_stop"() : () -> ()
    %56 = arith.truncf %55 : vector<4x16x16xf32> to vector<4x16x16xbf16>
    %57 = vector.extract_strided_slice %32 {offsets = [0, 16], sizes = [64, 16], strides = [1, 1]} : vector<64x96xbf16> to vector<64x16xbf16>
    %58 = vector.shape_cast %57 : vector<64x16xbf16> to vector<4x16x16xbf16>
    %59 = vector.extract_strided_slice %32 {offsets = [0, 48], sizes = [64, 16], strides = [1, 1]} : vector<64x96xbf16> to vector<64x16xbf16>
    %60 = vector.shape_cast %59 : vector<64x16xbf16> to vector<4x16x16xbf16>
    %61 = vector.extract_strided_slice %32 {offsets = [0, 80], sizes = [64, 16], strides = [1, 1]} : vector<64x96xbf16> to vector<64x16xbf16>
    %62 = vector.shape_cast %61 : vector<64x16xbf16> to vector<4x16x16xbf16>
    "tpu.trace_start"() <{level = 10 : i32, message = "wnd,wmd->wnm"}> : () -> ()
    %cst_23 = arith.constant dense<0.000000e+00> : vector<4x16x16xf32>
    %63 = tpu.matmul %58, %60, %cst_23 {dimension_numbers = #tpu.dot_dimension_numbers<[2], [2], [1], [1], [0, 0, 0, 1, 1, 1], [0], [0]>} : vector<4x16x16xbf16>, vector<4x16x16xbf16>, vector<4x16x16xf32> -> vector<4x16x16xf32>
    "tpu.trace_stop"() : () -> ()
    %c1 = arith.constant 1 : index
    %c0_24 = arith.constant 0 : index
    %c0_25 = arith.constant 0 : index
    %c0_26 = arith.constant 0 : index
    %64 = vector.load %arg5[%c1, %c0_24, %c0_25, %c0_26] : memref<2x1x16x16xf32, #tpu.memory_space<vmem>>, vector<1x1x16x16xf32>
    %65 = vector.shape_cast %64 : vector<1x1x16x16xf32> to vector<1x16x16xf32>
    %66 = vector.broadcast %65 : vector<1x16x16xf32> to vector<4x16x16xf32>
    %67 = arith.addf %63, %66 : vector<4x16x16xf32>
    %cst_27 = arith.constant dense<0xFF800000> : vector<4x16xf32>
    %68 = vector.multi_reduction <maximumf>, %67, %cst_27 [2] : vector<4x16x16xf32> to vector<4x16xf32>
    %69 = vector.shape_cast %68 : vector<4x16xf32> to vector<4x16x1xf32>
    %70 = vector.broadcast %69 : vector<4x16x1xf32> to vector<4x16x16xf32>
    %71 = arith.subf %67, %70 : vector<4x16x16xf32>
    %72 = math.exp %71 : vector<4x16x16xf32>
    %cst_28 = arith.constant dense<0.000000e+00> : vector<4x16xf32>
    %73 = vector.multi_reduction <add>, %72, %cst_28 [2] : vector<4x16x16xf32> to vector<4x16xf32>
    %74 = vector.shape_cast %73 : vector<4x16xf32> to vector<4x16x1xf32>
    %75 = tpu.reciprocal %74 {approx = true} : vector<4x16x1xf32> -> vector<4x16x1xf32>
    %76 = vector.broadcast %75 : vector<4x16x1xf32> to vector<4x16x16xf32>
    %77 = arith.mulf %72, %76 : vector<4x16x16xf32>
    %78 = arith.truncf %77 : vector<4x16x16xf32> to vector<4x16x16xbf16>
    "tpu.trace_start"() <{level = 10 : i32, message = "wnm,wmd->wnd"}> : () -> ()
    %cst_29 = arith.constant dense<0.000000e+00> : vector<4x16x16xf32>
    %79 = tpu.matmul %78, %62, %cst_29 {dimension_numbers = #tpu.dot_dimension_numbers<[2], [1], [1], [2], [0, 0, 0, 1, 1, 2], [0], [0]>} : vector<4x16x16xbf16>, vector<4x16x16xbf16>, vector<4x16x16xf32> -> vector<4x16x16xf32>
    "tpu.trace_stop"() : () -> ()
    %80 = arith.truncf %79 : vector<4x16x16xf32> to vector<4x16x16xbf16>
    %81 = tpu.concatenate %56, %80 in 2 : vector<4x16x16xbf16>, vector<4x16x16xbf16> -> vector<4x16x32xbf16>
    %82 = vector.shape_cast %81 : vector<4x16x32xbf16> to vector<64x32xbf16>
    %c0_30 = arith.constant 0 : index
    %c0_31 = arith.constant 0 : index
    %83 = vector.load %arg8[%c0_30, %c0_31] : memref<32x32xbf16, #tpu.memory_space<vmem>>, vector<32x32xbf16>
    %cst_32 = arith.constant dense<0.000000e+00> : vector<64x32xf32>
    %84 = tpu.matmul %82, %83, %cst_32 {dimension_numbers = #tpu.dot_dimension_numbers<[1], [0], [0], [1], [0, 0, 1, 1], [], []>} : vector<64x32xbf16>, vector<32x32xbf16>, vector<64x32xf32> -> vector<64x32xf32>
    %c0_33 = arith.constant 0 : index
    %c0_34 = arith.constant 0 : index
    %85 = vector.load %arg9[%c0_33, %c0_34] : memref<1x32xf32, #tpu.memory_space<vmem>>, vector<1x32xf32>
    %86 = vector.broadcast %85 : vector<1x32xf32> to vector<64x32xf32>
    %87 = arith.addf %84, %86 : vector<64x32xf32>
    %c0_35 = arith.constant 0 : index
    %c0_36 = arith.constant 0 : index
    %c0_37 = arith.constant 0 : index
    %88 = vector.load %arg10[%c0_35, %c0_36, %c0_37] : memref<1x64x32xf32, #tpu.memory_space<vmem>>, vector<1x64x32xf32>
    %89 = vector.shape_cast %88 : vector<1x64x32xf32> to vector<64x32xf32>
    %90 = vector.shape_cast %87 : vector<64x32xf32> to vector<1x64x32xf32>
    tpu.vector_store %arg10[%c0_35, %c0_36, %c0_37], %90 {strides = array<i32>} : memref<1x64x32xf32, #tpu.memory_space<vmem>>, vector<1x64x32xf32>,
    return
  }
  func.func @transform_0(%arg0: i32, %arg1: i32) -> (i32, i32, i32) {
    %c0_i32 = arith.constant 0 : i32
    %c0_i32_0 = arith.constant 0 : i32
    return %arg0, %arg1, %c0_i32 : i32, i32, i32
  }
  func.func @transform_1(%arg0: i32, %arg1: i32) -> (i32, i32) {
    %c0_i32 = arith.constant 0 : i32
    %c0_i32_0 = arith.constant 0 : i32
    %c0_i32_1 = arith.constant 0 : i32
    return %c0_i32, %c0_i32_0 : i32, i32
  }
  func.func @transform_2(%arg0: i32, %arg1: i32) -> (i32, i32) {
    %c0_i32 = arith.constant 0 : i32
    %c0_i32_0 = arith.constant 0 : i32
    %c0_i32_1 = arith.constant 0 : i32
    return %c0_i32, %c0_i32_0 : i32, i32
  }
  func.func @transform_3(%arg0: i32, %arg1: i32) -> (i32, i32, i32, i32) {
    %c0_i32 = arith.constant 0 : i32
    %c0_i32_0 = arith.constant 0 : i32
    %c0_i32_1 = arith.constant 0 : i32
    %c0_i32_2 = arith.constant 0 : i32
    %c0_i32_3 = arith.constant 0 : i32
    return %c0_i32, %c0_i32_0, %c0_i32_1, %c0_i32_2 : i32, i32, i32, i32
  }
  func.func @transform_4(%arg0: i32, %arg1: i32) -> (i32, i32) {
    %c0_i32 = arith.constant 0 : i32
    %c0_i32_0 = arith.constant 0 : i32
    %c0_i32_1 = arith.constant 0 : i32
    return %c0_i32, %c0_i32_0 : i32, i32
  }
  func.func @transform_5(%arg0: i32, %arg1: i32) -> (i32, i32) {
    %c0_i32 = arith.constant 0 : i32
    %c0_i32_0 = arith.constant 0 : i32
    %c0_i32_1 = arith.constant 0 : i32
    return %c0_i32, %c0_i32_0 : i32, i32
  }
  func.func @transform_6(%arg0: i32, %arg1: i32) -> (i32, i32) {
    %c0_i32 = arith.constant 0 : i32
    %c0_i32_0 = arith.constant 0 : i32
    %c0_i32_1 = arith.constant 0 : i32
    return %c0_i32, %c0_i32_0 : i32, i32
  }
  func.func @transform_7(%arg0: i32, %arg1: i32) -> (i32, i32) {
    %c0_i32 = arith.constant 0 : i32
    %c0_i32_0 = arith.constant 0 : i32
    %c0_i32_1 = arith.constant 0 : i32
    return %c0_i32, %c0_i32_0 : i32, i32
  }
  func.func @transform_8(%arg0: i32, %arg1: i32) -> (i32, i32, i32) {
    %c0_i32 = arith.constant 0 : i32
    %c0_i32_0 = arith.constant 0 : i32
    return %arg0, %arg1, %c0_i32 : i32, i32, i32
  }
}

</mosaic_0001>

<bundles_post_ra>
// kernel: tpu_custom_call.1
= control target key start
LH: loop header
LB: loop body
LE: loop exit
PB: predicated region body
PF: predicated region fallthrough
CT: control target
= control target key end

     0   :  { %s2199_s27 = smov 0   ;;  %s2201_s28 = smov 0   ;;  %s2571_s0 = inlined_call_operand.vmem [shape: f32[2,64,32], index: 0, kind: input, shape index: {}]   ;;  %s2572_s1 = inlined_call_operand.vmem [shape: f32[1,32], index: 1, kind: input, shape index: {}]   ;;  %s2573_s2 = inlined_call_operand.vmem [shape: f32[1,32], index: 2, kind: input, shape index: {}]   ;;  %s2574_s3 = inlined_call_operand.vmem [shape: f32[2,1,16,16], index: 3, kind: input, shape index: {}]   ;;  %s2575_s4 = inlined_call_operand.vmem [shape: bf16[32,96], index: 4, kind: input, shape index: {}]   ;;  %s2576_s5 = inlined_call_operand.vmem [shape: f32[1,96], index: 5, kind: input, shape index: {}]   ;;  %s2577_s6 = inlined_call_operand.vmem [shape: bf16[32,32], index: 6, kind: input, shape index: {}]   ;;  %s2578_s7 = inlined_call_operand.vmem [shape: f32[1,32], index: 7, kind: input, shape index: {}]   ;;  %s2579_s8 = inlined_call_operand.vmem [shape: f32[2,64,32], index: 8, kind: output, shape index: {}]  }
   0x1   :  { %s2203_s29 = smov 0  }
   0x2 LB: > { %s30_s30 = sadd.s32 1, %s2140_s28  ;;  %p1795_p0 = scmp.ge.s32.totalorder %s2144_s29, 1  ;;  %s2144_s29 = sphi %s2203_s29, %s18_s29   ;;  %s2140_s28 = sphi %s2201_s28, %s2581_s28   ;;  %s2136_s27 = sphi %s2199_s27, %s2580_s27  }
   0x3   : > { %p32_p1 = scmp.ge.s32.totalorder %s30_s30, 2  ;;  %p283_p2 = scmp.lt.s32.totalorder %s2144_s29, 3 }
   0x5   : > { %s2583_s30 = smov (%p32_p1, %s30_s30), 0  ;;  %p284_p3 = pnand %p1795_p0, %p283_p2 }
   0x6   : > { %p326_p4 = scmp.lt.s32.totalorder (!%p284_p3), %s2136_s27, 1  ;;  %s2148_s23 = smov (!%p284_p3), 96  }
   0x7   : > { %287 = sbr.rel (%p284_p3) target bundleno = 2394 (0x95a), region = 52  ;;  %s2149_s11 = smov (!%p284_p3), 64  }
   0x8   : > { %s2151_s13 = smov (!%p284_p3), 112   ;;  %s2152_s18 = smov (!%p284_p3), 48  }
   0xc   : > { %s2585_s27 = smov (!%p326_p4, %s2136_s27), 1  ;;  %vm354_vm0 = vcmask 261120   ;;  %v2038_v56 = vld [vmem:[%s2575_s4 + $0x8] sm:$0xff]   ;;  %v2039_v57 = vld [vmem:[%s2575_s4] sm:$0xff]   ;;  %vm2147_vm1 = vmmov 0   ;;  %vm603_vm2 = vcmask 130048  }
   0xd   : > { %s1836_s9 = sshll.u32 %s2585_s27, 6  ;;  %1882 = vmatprep.subr.bf16.mxu0 %v2038_v56  ;;  %2002 = vmatprep.subr.bf16.mxu1 %v2038_v56 }
   0xe   : > { %s333_s12 = scalar_lea.vmem %s2571_s0, %s1836_s9  ;;  %1883 = vmatpush3.bf16.msra.mxu0 %v2038_v56  ;;  %2004 = vmatpush3.bf16.msra.mxu1 %v2038_v56 }
   0xf   : > { %v346_v0 = vld [vmem:[%s333_s12] sm:$0xff]  ;;  %v348_v1 = vld [vmem:[%s333_s12 + $0x10] sm:$0xff]  ;;  %v347_v2 = vld [vmem:[%s333_s12 + $0x8] sm:$0xff]  ;;  %1884 = vmatprep.subr.bf16.mxu0 %v2039_v57  ;;  %2003 = vmatprep.subr.bf16.mxu1 %v2039_v57 }
  0x10   : > { %v355_v3 = vsel %vm354_vm0, %v346_v0, 0.0  ;;  %v361_v4 = vsel %vm354_vm0, %v348_v1, 0.0  ;;  %v349_v5 = vld [vmem:[%s333_s12 + $0x18] sm:$0xff]  ;;  %v358_v6 = vsel %vm354_vm0, %v347_v2, 0.0  ;;  %v350_v8 = vld [vmem:[%s333_s12 + $0x20] sm:$0xff]  ;;  %v351_v9 = vld [vmem:[%s333_s12 + $0x28] sm:$0xff] }
  0x11   : > { %356 = vadd.xlane.f32.xlu0 %v355_v3  ;;  %362 = vadd.xlane.f32.xlu1 %v361_v4  ;;  %v364_v7 = vsel %vm354_vm0, %v349_v5, 0.0  ;;  %v367_v10 = vsel %vm354_vm0, %v350_v8, 0.0  ;;  %v370_v11 = vsel %vm354_vm0, %v351_v9, 0.0  ;;  %v352_v12 = vld [vmem:[%s333_s12 + $0x30] sm:$0xff]  ;;  %v353_v13 = vld [vmem:[%s333_s12 + $0x38] sm:$0xff]  ;;  %s2150_s12 = smov 80  }
  0x12   : > { %v373_v14 = vsel %vm354_vm0, %v352_v12, 0.0  ;;  %v376_v15 = vsel %vm354_vm0, %v353_v13, 0.0  ;;  %1885 = vmatpush3.bf16.msra.mxu0 %v2039_v57  ;;  %2005 = vmatpush3.bf16.msra.mxu1 %v2039_v57 }
  0x15   : > { %359 = vadd.xlane.f32.xlu0 %v358_v6  ;;  %365 = vadd.xlane.f32.xlu1 %v364_v7 }
  0x19   : > { %368 = vadd.xlane.f32.xlu0 %v367_v10  ;;  %371 = vadd.xlane.f32.xlu1 %v370_v11 }
  0x1d   : > { %374 = vadd.xlane.f32.xlu0 %v373_v14  ;;  %377 = vadd.xlane.f32.xlu1 %v376_v15 }
  0x9a   : > { %v357_v16 = vpop.xlane.xlu0 %356  ;;  %v363_v17 = vpop.xlane.xlu1 %362 }
  0x9b   : > { %v380_v18 = vmul.f32 0.03125, %v357_v16  ;;  %v382_v19 = vmul.f32 0.03125, %v363_v17 }
  0x9d   : > { %v2233_v20 = vsub.f32 %v346_v0, %v380_v18  ;;  %v2235_v21 = vsub.f32 %v348_v1, %v382_v19 }
  0x9e   : > { %v360_v22 = vpop.xlane.xlu0 %359  ;;  %v366_v23 = vpop.xlane.xlu1 %365 }
  0x9f   : > { %v381_v24 = vmul.f32 0.03125, %v360_v22  ;;  %v383_v25 = vmul.f32 0.03125, %v366_v23  ;;  %v396_v26 = vmul.f32 %v2233_v20, %v2233_v20  ;;  %v398_v27 = vmul.f32 %v2235_v21, %v2235_v21  ;;  %v1800_v22 = vld [vmem:[%s2572_s1] ss:$0 sm:$0xff] }
  0xa1   : > { %v2241_v28 = vsub.f32 %v347_v2, %v381_v24  ;;  %v2243_v29 = vsub.f32 %v349_v5, %v383_v25  ;;  %v404_v30 = vsel %vm354_vm0, %v396_v26, 0.0  ;;  %v410_v33 = vsel %vm354_vm0, %v398_v27, 0.0  ;;  %v1801_v27 = vld [vmem:[%s2573_s2] ss:$0 sm:$0xff] }
  0xa2   : > { %405 = vadd.xlane.f32.xlu0 %v404_v30  ;;  %v369_v31 = vpop.xlane.xlu0 %368  ;;  %v372_v32 = vpop.xlane.xlu1 %371 }
  0xa3   : > { %v384_v34 = vmul.f32 0.03125, %v369_v31  ;;  %v385_v35 = vmul.f32 0.03125, %v372_v32  ;;  %v397_v36 = vmul.f32 %v2241_v28, %v2241_v28  ;;  %v399_v37 = vmul.f32 %v2243_v29, %v2243_v29 }
  0xa5   : > { %v2251_v38 = vsub.f32 %v350_v8, %v384_v34  ;;  %v2253_v39 = vsub.f32 %v351_v9, %v385_v35  ;;  %v407_v40 = vsel %vm354_vm0, %v397_v36, 0.0  ;;  %v413_v43 = vsel %vm354_vm0, %v399_v37, 0.0 }
  0xa6   : > { %411 = vadd.xlane.f32.xlu0 %v410_v33  ;;  %408 = vadd.xlane.f32.xlu1 %v407_v40  ;;  %v375_v41 = vpop.xlane.xlu0 %374  ;;  %v378_v42 = vpop.xlane.xlu1 %377 }
  0xa7   : > { %v386_v44 = vmul.f32 0.03125, %v375_v41  ;;  %v387_v45 = vmul.f32 0.03125, %v378_v42  ;;  %v400_v46 = vmul.f32 %v2251_v38, %v2251_v38  ;;  %v401_v47 = vmul.f32 %v2253_v39, %v2253_v39 }
  0xa9   : > { %v2261_v48 = vsub.f32 %v352_v12, %v386_v44  ;;  %v2263_v49 = vsub.f32 %v353_v13, %v387_v45  ;;  %v416_v50 = vsel %vm354_vm0, %v400_v46, 0.0  ;;  %v419_v51 = vsel %vm354_vm0, %v401_v47, 0.0 }
  0xaa   : > { %414 = vadd.xlane.f32.xlu1 %v413_v43  ;;  %417 = vadd.xlane.f32.xlu0 %v416_v50 }
  0xab   : > { %v402_v52 = vmul.f32 %v2261_v48, %v2261_v48  ;;  %v403_v53 = vmul.f32 %v2263_v49, %v2263_v49 }
  0xad   : > { %v422_v54 = vsel %vm354_vm0, %v402_v52, 0.0  ;;  %v425_v55 = vsel %vm354_vm0, %v403_v53, 0.0 }
  0xae   : > { %420 = vadd.xlane.f32.xlu1 %v419_v51  ;;  %423 = vadd.xlane.f32.xlu0 %v422_v54 }
  0xb2   : > { %426 = vadd.xlane.f32.xlu1 %v425_v55 }
 0x12b   : > { %v406_v58 = vpop.xlane.xlu0 %405 }
 0x12c   : > { %v428_v59 = vmul.f32 0.03125, %v406_v58 }
 0x12e   : > { %v436_v60 = vadd.f32 1e-05, %v428_v59 }
 0x12f   : > { %v409_v61 = vpop.xlane.xlu1 %408  ;;  %v412_v62 = vpop.xlane.xlu0 %411 }
 0x130   : > { %2042 = vrsqrt.f32 %v436_v60  ;;  %v429_v63 = vmul.f32 0.03125, %v409_v61  ;;  %v430_v0 = vmul.f32 0.03125, %v412_v62 }
 0x132   : > { %v437_v1 = vadd.f32 1e-05, %v429_v63  ;;  %v438_v2 = vadd.f32 1e-05, %v430_v0 }
 0x133   : > { %v415_v3 = vpop.xlane.xlu1 %414  ;;  %v418_v4 = vpop.xlane.xlu0 %417 }
 0x134   : > { %2044 = vrsqrt.f32 %v437_v1  ;;  %v431_v5 = vmul.f32 0.03125, %v415_v3  ;;  %v432_v6 = vmul.f32 0.03125, %v418_v4 }
 0x135   : > { %2046 = vrsqrt.f32 %v438_v2 }
 0x136   : > { %v439_v7 = vadd.f32 1e-05, %v431_v5  ;;  %v440_v8 = vadd.f32 1e-05, %v432_v6 }
 0x137   : > { %v421_v9 = vpop.xlane.xlu1 %420  ;;  %v424_v10 = vpop.xlane.xlu0 %423 }
 0x138   : > { %2048 = vrsqrt.f32 %v439_v7  ;;  %v433_v11 = vmul.f32 0.03125, %v421_v9  ;;  %v434_v12 = vmul.f32 0.03125, %v424_v10 }
 0x139   : > { %2050 = vrsqrt.f32 %v440_v8 }
 0x13a   : > { %v441_v13 = vadd.f32 1e-05, %v433_v11  ;;  %v442_v14 = vadd.f32 1e-05, %v434_v12 }
 0x13b   : > { %v427_v15 = vpop.xlane.xlu1 %426 }
 0x13c   : > { %2052 = vrsqrt.f32 %v441_v13  ;;  %v435_v16 = vmul.f32 0.03125, %v427_v15 }
 0x13d   : > { %v2043_v17 = vpop.eup %2042  ;;  %2054 = vrsqrt.f32 %v442_v14 }
 0x13e   : > { %v443_v18 = vadd.f32 1e-05, %v435_v16  ;;  %v452_v19 = vmul.f32 %v2043_v17, %v2233_v20 }
 0x140   : > { %2056 = vrsqrt.f32 %v443_v18  ;;  %v467_v26 = vmul.f32 %v1800_v22, %v452_v19 }
 0x141   : > { %v2045_v23 = vpop.eup %2044 }
 0x142   : > { %v2047_v24 = vpop.eup %2046  ;;  %v453_v25 = vmul.f32 %v2045_v23, %v2241_v28  ;;  %v482_v20 = vadd.f32 %v1801_v27, %v467_v26 }
 0x143   : > { %v454_v30 = vmul.f32 %v2047_v24, %v2235_v21  ;;  %v598_v24 = vld [vmem:[%s2574_s3] sm:$0xff] }
 0x144   : > { %v468_v31 = vmul.f32 %v1800_v22, %v453_v25 }
 0x145   : > { %v2049_v32 = vpop.eup %2048  ;;  %v469_v36 = vmul.f32 %v1800_v22, %v454_v30  ;;  %v599_v30 = vld [vmem:[%s2574_s3 + $0x8] sm:$0xff] }
 0x146   : > { %v2051_v33 = vpop.eup %2050  ;;  %v483_v34 = vadd.f32 %v1801_v27, %v468_v31  ;;  %v455_v35 = vmul.f32 %v2049_v32, %v2243_v29 }
 0x147   : > { %v456_v37 = vmul.f32 %v2051_v33, %v2251_v38  ;;  %v484_v43 = vadd.f32 %v1801_v27, %v469_v36 }
 0x148   : > { %v490_v40 = vpack.c.bf16 %v483_v34, %v482_v20  ;;  %v470_v41 = vmul.f32 %v1800_v22, %v455_v35 }
 0x149   : > { %v2053_v28 = vpop.eup %2052  ;;  %v471_v45 = vmul.f32 %v1800_v22, %v456_v37 }
 0x14a   : > { %v2055_v42 = vpop.eup %2054  ;;  %1886 = vmatprep.mubr.msk.bf16.mxu0 %vm354_vm0, %v490_v40  ;;  %v485_v44 = vadd.f32 %v1801_v27, %v470_v41  ;;  %v457_v21 = vmul.f32 %v2053_v28, %v2253_v39 }
 0x14b   : > { %v458_v46 = vmul.f32 %v2055_v42, %v2261_v48  ;;  %v486_v29 = vadd.f32 %v1801_v27, %v471_v45  ;;  %v2146_v48 = vmov 0.0  }
 0x14c   : > { %v491_v47 = vpack.c.bf16 %v485_v44, %v484_v43  ;;  %v472_v50 = vmul.f32 %v1800_v22, %v457_v21  ;;  %1894 = vmatprep.subr.bf16.mxu1 %v2146_v48  ;;  %1906 = vmatprep.subr.bf16.mxu0 %v2146_v48 }
 0x14d   : > { %v2057_v51 = vpop.eup %2056  ;;  %v473_v53 = vmul.f32 %v1800_v22, %v458_v46 }
 0x14e   : > { %1887 = vmatmul.mubr.msk.bf16.vlgmr.msra.gmra.mxu0 %vm354_vm0, %v491_v47  ;;  %v487_v38 = vadd.f32 %v1801_v27, %v472_v50  ;;  %v459_v52 = vmul.f32 %v2057_v51, %v2263_v49  ;;  %v1802_v49 = vld [vmem:[%s2576_s5] ss:$0 sm:$0xff] }
 0x14f   : > { %v488_v56 = vadd.f32 %v1801_v27, %v473_v53  ;;  %1908 = vmatprep.mubr.msk.bf16.mxu0 %vm2147_vm1, %v2146_v48 }
 0x150   : > { %v492_v54 = vpack.c.bf16 %v487_v38, %v486_v29  ;;  %v474_v55 = vmul.f32 %v1800_v22, %v459_v52 }
 0x152   : > { %1890 = vmatprep.mubr.msk.bf16.mxu1 %vm354_vm0, %v492_v54  ;;  %v489_v57 = vadd.f32 %v1801_v27, %v474_v55 }
 0x154   : > { %v493_v39 = vpack.c.bf16 %v489_v57, %v488_v56 }
 0x156   : > { %1891 = vmatmul.mubr.msk.bf16.vlgmr.msra.gmra.mxu1 %vm354_vm0, %v493_v39 }
 0x157   : > { %1896 = vmatprep.mubr.msk.bf16.mxu1 %vm2147_vm1, %v2146_v48 }
 0x20e   : > { %v1888_v58 = vpop.f32.mrf.mxu0 }
 0x20f   : > { %v572_v61 = vadd.f32 %v1888_v58, %v1802_v49 }
 0x210   : > { %v563_v59 = vpop.f32.mrf.mxu0 }
 0x211   : > { %v564_v0 = vadd.f32 %v1802_v49, %v563_v59 }
 0x212   : > { %v1889_v60 = vpop.f32.mrf.mxu0 }
 0x213   : > { %v575_v62 = vadd.f32 %v1889_v60, %v1802_v49 }
 0x214   : > { %v566_v63 = vpop.f32.mrf.mxu0 }
 0x215   : > { %v2306_v1 = vpack.c.bf16 %v575_v62, %v572_v61  ;;  %v567_v2 = vadd.f32 %v1802_v49, %v566_v63 }
 0x216   : > { %v1892_v3 = vpop.f32.mrf.mxu1 }
 0x217   : > { %v2308_v4 = vpack.c.bf16 %v567_v2, %v564_v0  ;;  %652 = vrot.lane.b32.xlu1 %v2306_v1, %s2148_s23  ;;  %v588_v12 = vadd.f32 %v1892_v3, %v1802_v49 }
 0x218   : > { %v579_v5 = vpop.f32.mrf.mxu1 }
 0x219   : > { %601 = vrot.lane.b32.xlu0 %v2308_v4, %s2148_s23  ;;  %v580_v8 = vadd.f32 %v1802_v49, %v579_v5 }
 0x21a   : > { %v1893_v6 = vpop.f32.mrf.mxu1 }
 0x21b   : > { %v591_v10 = vadd.f32 %v1893_v6, %v1802_v49 }
 0x21c   : > { %v582_v7 = vpop.f32.mrf.mxu1 }
 0x21d   : > { %v583_v9 = vadd.f32 %v1802_v49, %v582_v7  ;;  %v2315_v13 = vpack.c.bf16 %v591_v10, %v588_v12 }
 0x21f   : > { %v2312_v11 = vpack.c.bf16 %v583_v9, %v580_v8 }
 0x221   : > { %702 = vrot.lane.b32.xlu1 %v2312_v11, %s2148_s23 }
 0x225   : > { %752 = vrot.lane.b32.xlu1 %v2315_v13, %s2148_s23  ;;  %s2153_s23 = smov 16  }
 0x289   : > { %v653_v16 = vpop.permute.xlu1 %652 }
 0x28a   : > { %v658_v18 = vsel %vm603_vm2, %v653_v16, 0 }
 0x28b   : > { %v602_v14 = vpop.permute.xlu0 %601 }
 0x28c   : > { %v608_v15 = vsel %vm603_vm2, %v602_v14, 0 }
 0x28d   : > { %1895 = vmatpush3.bf16.xpose.msra.mxu1 %v608_v15 }
 0x28e   : > { %1900 = vmatprep.subr.bf16.mxu1 %v2146_v48 }
 0x293   : > { %v703_v17 = vpop.permute.xlu1 %702 }
 0x294   : > { %v708_v19 = vsel %vm603_vm2, %v703_v17, 0  ;;  %1897 = vmatmul.mubr.msk.bf16.vlgmr.msra.gmra.mxu1 %vm603_vm2, %v2308_v4 }
 0x295   : > { %1901 = vmatpush3.bf16.xpose.msra.mxu1 %v658_v18  ;;  %1907 = vmatpush3.bf16.xpose.msra.mxu0 %v708_v19 }
 0x296   : > { %1902 = vmatprep.mubr.msk.bf16.mxu1 %vm2147_vm1, %v2146_v48  ;;  %1912 = vmatprep.subr.bf16.mxu1 %v2146_v48 }
 0x297   : > { %1918 = vmatprep.subr.bf16.mxu0 %v2146_v48  ;;  %v753_v22 = vpop.permute.xlu1 %752 }
 0x298   : > { %v758_v23 = vsel %vm603_vm2, %v753_v22, 0 }
 0x29c   : > { %1903 = vmatmul.mubr.msk.bf16.vlgmr.msra.gmra.mxu1 %vm603_vm2, %v2306_v1  ;;  %1909 = vmatmul.mubr.msk.bf16.vlgmr.msra.gmra.mxu0 %vm603_vm2, %v2312_v11 }
 0x29d   : > { %1913 = vmatpush3.bf16.xpose.msra.mxu1 %v758_v23  ;;  %1914 = vmatprep.mubr.msk.bf16.mxu1 %vm2147_vm1, %v2146_v48 }
 0x29e   : > { %1924 = vmatprep.subr.bf16.mxu1 %v2146_v48  ;;  %1920 = vmatprep.mubr.msk.bf16.mxu0 %vm2147_vm1, %v2146_v48 }
 0x2a4   : > { %1915 = vmatmul.mubr.msk.bf16.vlgmr.msra.gmra.mxu1 %vm603_vm2, %v2315_v13 }
 0x2a5   : > { %1926 = vmatprep.mubr.msk.bf16.mxu1 %vm2147_vm1, %v2146_v48 }
 0x354   : > { %v644_v25 = vpop.f32.mrf.mxu1 }
 0x355   : > { %v645_v26 = vadd.f32 %v644_v25, %v598_v24 }
 0x356   : > { %v1898_v27 = vpop.f32.mrf.mxu1 }
 0x357   : > { %v801_v31 = vsel %vm603_vm2, %v645_v26, -inf }
 0x358   : > { %802 = vmax.xlane.f32.xlu0 %v801_v31  ;;  %v647_v32 = vpop.f32.mrf.mxu1 }
 0x359   : > { %v648_v33 = vadd.f32 %v647_v32, %v599_v30 }
 0x35a   : > { %v1899_v20 = vpop.f32.mrf.mxu1 }
 0x35b   : > { %v804_v34 = vsel %vm603_vm2, %v648_v33, -inf }
 0x35c   : > { %v744_v35 = vpop.f32.mrf.mxu0  ;;  %805 = vmax.xlane.f32.xlu1 %v804_v34  ;;  %v694_v36 = vpop.f32.mrf.mxu1 }
 0x35d   : > { %v695_v37 = vadd.f32 %v694_v36, %v598_v24  ;;  %v745_v47 = vadd.f32 %v744_v35, %v598_v24 }
 0x35e   : > { %v1904_v40 = vpop.f32.mrf.mxu1  ;;  %v1910_v41 = vpop.f32.mrf.mxu0 }
 0x35f   : > { %v807_v28 = vsel %vm603_vm2, %v695_v37, -inf  ;;  %v813_v53 = vsel %vm603_vm2, %v745_v47, -inf }
 0x360   : > { %v747_v42 = vpop.f32.mrf.mxu0  ;;  %808 = vmax.xlane.f32.xlu0 %v807_v28  ;;  %v697_v43 = vpop.f32.mrf.mxu1 }
 0x361   : > { %v748_v44 = vadd.f32 %v747_v42, %v599_v30  ;;  %v2351_v21 = vadd.f32 %v697_v43, %v599_v30 }
 0x362   : > { %v1905_v45 = vpop.f32.mrf.mxu1  ;;  %v1911_v46 = vpop.f32.mrf.mxu0 }
 0x363   : > { %v816_v50 = vsel %vm603_vm2, %v748_v44, -inf  ;;  %v810_v51 = vsel %vm603_vm2, %v2351_v21, -inf }
 0x364   : > { %817 = vmax.xlane.f32.xlu1 %v816_v50  ;;  %811 = vmax.xlane.f32.xlu0 %v810_v51  ;;  %v794_v29 = vpop.f32.mrf.mxu1 }
 0x365   : > { %v795_v52 = vadd.f32 %v794_v29, %v598_v24 }
 0x366   : > { %v1916_v38 = vpop.f32.mrf.mxu1 }
 0x367   : > { %v819_v57 = vsel %vm603_vm2, %v795_v52, -inf }
 0x368   : > { %814 = vmax.xlane.f32.xlu0 %v813_v53  ;;  %v797_v54 = vpop.f32.mrf.mxu1 }
 0x369   : > { %v2357_v55 = vadd.f32 %v797_v54, %v599_v30 }
 0x36a   : > { %v1917_v56 = vpop.f32.mrf.mxu1 }
 0x36b   : > { %v822_v39 = vsel %vm603_vm2, %v2357_v55, -inf }
 0x36c   : > { %820 = vmax.xlane.f32.xlu0 %v819_v57  ;;  %823 = vmax.xlane.f32.xlu1 %v822_v39 }
 0x3e1   : > { %v803_v58 = vpop.xlane.xlu0 %802 }
 0x3e2   : > { %v825_v49 = vsub.f32 %v645_v26, %v803_v58 }
 0x3e4   : > { %v833_v59 = vmul.f32 1.442695, %v825_v49 }
 0x3e5   : > { %v806_v60 = vpop.xlane.xlu1 %805 }
 0x3e6   : > { %2058 = vpow2.f32 %v833_v59  ;;  %v826_v61 = vsub.f32 %v648_v33, %v806_v60 }
 0x3e8   : > { %v835_v62 = vmul.f32 1.442695, %v826_v61 }
 0x3e9   : > { %v809_v63 = vpop.xlane.xlu0 %808 }
 0x3ea   : > { %2060 = vpow2.f32 %v835_v62  ;;  %v827_v5 = vsub.f32 %v695_v37, %v809_v63 }
 0x3ec   : > { %v837_v10 = vmul.f32 1.442695, %v827_v5 }
 0x3ed   : > { %v818_v0 = vpop.xlane.xlu1 %817  ;;  %v812_v2 = vpop.xlane.xlu0 %811 }
 0x3ee   : > { %v830_v3 = vsub.f32 %v748_v44, %v818_v0  ;;  %v828_v26 = vsub.f32 %v2351_v21, %v812_v2 }
 0x3f0   : > { %v843_v6 = vmul.f32 1.442695, %v830_v3  ;;  %v839_v30 = vmul.f32 1.442695, %v828_v26 }
 0x3f1   : > { %v815_v7 = vpop.xlane.xlu0 %814 }
 0x3f2   : > { %2062 = vpow2.f32 %v843_v6  ;;  %v829_v8 = vsub.f32 %v745_v47, %v815_v7 }
 0x3f3   : > { %v2362_v9 = vpop.eup %2058 }
 0x3f4   : > { %v841_v12 = vmul.f32 1.442695, %v829_v8  ;;  %v849_v14 = vsel %vm603_vm2, %v2362_v9, 0.0 }
 0x3f5   : > { %850 = vadd.xlane.f32.xlu0 %v849_v14  ;;  %v821_v25 = vpop.xlane.xlu0 %820  ;;  %v824_v35 = vpop.xlane.xlu1 %823 }
 0x3f6   : > { %2064 = vpow2.f32 %v841_v12  ;;  %v831_v27 = vsub.f32 %v795_v52, %v821_v25  ;;  %v832_v36 = vsub.f32 %v2357_v55, %v824_v35  ;;  %v1817_v35 = vld [vmem:[%s2574_s3 + $0x10] sm:$0xff] }
 0x3f7   : > { %v2061_v15 = vpop.eup %2060  ;;  %2066 = vpow2.f32 %v837_v10 }
 0x3f8   : > { %v852_v16 = vsel %vm603_vm2, %v2061_v15, 0.0  ;;  %v845_v31 = vmul.f32 1.442695, %v831_v27  ;;  %2068 = vpow2.f32 %v839_v30  ;;  %v847_v37 = vmul.f32 1.442695, %v832_v36 }
 0x3f9   : > { %853 = vadd.xlane.f32.xlu1 %v852_v16 }
 0x3fa   : > { %2070 = vpow2.f32 %v845_v31 }
 0x3fb   : > { %2072 = vpow2.f32 %v847_v37 }
 0x3ff   : > { %v2367_v17 = vpop.eup %2062 }
 0x400   : > { %v864_v18 = vsel %vm603_vm2, %v2367_v17, 0.0 }
 0x401   : > { %865 = vadd.xlane.f32.xlu1 %v864_v18 }
 0x403   : > { %v2371_v19 = vpop.eup %2064 }
 0x404   : > { %v861_v22 = vsel %vm603_vm2, %v2371_v19, 0.0  ;;  %v2375_v23 = vpop.eup %2066 }
 0x405   : > { %862 = vadd.xlane.f32.xlu0 %v861_v22  ;;  %v855_v24 = vsel %vm603_vm2, %v2375_v23, 0.0  ;;  %v2384_v32 = vpop.eup %2068 }
 0x406   : > { %v858_v34 = vsel %vm603_vm2, %v2384_v32, 0.0 }
 0x407   : > { %v2386_v33 = vpop.eup %2070 }
 0x408   : > { %v867_v20 = vsel %vm603_vm2, %v2386_v33, 0.0  ;;  %v2398_v40 = vpop.eup %2072 }
 0x409   : > { %856 = vadd.xlane.f32.xlu0 %v855_v24  ;;  %v870_v41 = vsel %vm603_vm2, %v2398_v40, 0.0 }
 0x412   : > { %940 = vrot.lane.b32.xlu1 %v2306_v1, %s2149_s11 }
 0x416   : > { %987 = vrot.lane.b32.xlu1 %v2312_v11, %s2149_s11 }
 0x41a   : > { %1034 = vrot.lane.b32.xlu1 %v2315_v13, %s2149_s11 }
 0x41f   : > { %893 = vrot.lane.b32.xlu0 %v2308_v4, %s2149_s11  ;;  %s343_s11 = scalar_lea.vmem %s2579_s8, %s1836_s9 }
 0x43e   : > { %868 = vadd.xlane.f32.xlu0 %v867_v20  ;;  %859 = vadd.xlane.f32.xlu1 %v858_v34 }
 0x44f   : > { %1141 = vrot.lane.b32.xlu1 %v2306_v1, %s2150_s12 }
 0x454   : > { %1090 = vrot.lane.b32.xlu0 %v2308_v4, %s2150_s12 }
 0x458   : > { %1088 = vrot.lane.b32.xlu0 %v2308_v4, %s2151_s13 }
 0x45c   : > { %1139 = vrot.lane.b32.xlu0 %v2306_v1, %s2151_s13 }
 0x460   : > { %1190 = vrot.lane.b32.xlu0 %v2312_v11, %s2151_s13 }
 0x473   : > { %871 = vadd.xlane.f32.xlu1 %v870_v41  ;;  %v1818_v41 = vld [vmem:[%s2574_s3 + $0x18] sm:$0xff] }
 0x47e   : > { %v851_v42 = vpop.xlane.xlu0 %850 }
 0x482   : > { %v854_v28 = vpop.xlane.xlu1 %853 }
 0x483   : > { %2074 = vrcp.f32 %v854_v28 }
 0x484   : > { %1192 = vrot.lane.b32.xlu1 %v2312_v11, %s2150_s12  ;;  %2076 = vrcp.f32 %v851_v42 }
 0x488   : > { %1243 = vrot.lane.b32.xlu1 %v2315_v13, %s2150_s12 }
 0x48a   : > { %v866_v43 = vpop.xlane.xlu1 %865 }
 0x48b   : > { %2078 = vrcp.f32 %v866_v43 }
 0x48c   : > { %1241 = vrot.lane.b32.xlu1 %v2315_v13, %s2151_s13 }
 0x48e   : > { %v863_v44 = vpop.xlane.xlu0 %862  ;;  %v941_v21 = vpop.permute.xlu1 %940 }
 0x48f   : > { %2080 = vrcp.f32 %v863_v44  ;;  %1925 = vmatpush3.bf16.msra.mxu1 %v941_v21 }
 0x490   : > { %1936 = vmatprep.subr.bf16.mxu1 %v2146_v48  ;;  %v2075_v45 = vpop.eup %2074 }
 0x491   : > { %v2077_v47 = vpop.eup %2076  ;;  %v882_v50 = vmul.f32 %v2075_v45, %v2061_v15 }
 0x492   : > { %v857_v46 = vpop.xlane.xlu0 %856  ;;  %v881_v29 = vmul.f32 %v2077_v47, %v2362_v9  ;;  %v988_v53 = vpop.permute.xlu1 %987 }
 0x493   : > { %2082 = vrcp.f32 %v857_v46 }
 0x494   : > { %v889_v38 = vpack.c.bf16 %v882_v50, %v881_v29 }
 0x496   : > { %v894_v51 = vpop.permute.xlu0 %893  ;;  %v1035_v39 = vpop.permute.xlu1 %1034 }
 0x497   : > { %1919 = vmatpush3.bf16.msra.mxu0 %v894_v51 }
 0x498   : > { %1930 = vmatprep.subr.bf16.mxu0 %v2146_v48  ;;  %v2079_v52 = vpop.eup %2078 }
 0x499   : > { %v886_v56 = vmul.f32 %v2079_v52, %v2367_v17 }
 0x49a   : > { %1921 = vmatmul.mubr.msk.bf16.vlgmr.msra.gmra.mxu0 %vm603_vm2, %v889_v38 }
 0x49b   : > { %1931 = vmatpush3.bf16.msra.mxu0 %v988_v53  ;;  %1932 = vmatprep.mubr.msk.bf16.mxu0 %vm2147_vm1, %v2146_v48 }
 0x49c   : > { %v2081_v54 = vpop.eup %2080  ;;  %1942 = vmatprep.subr.bf16.mxu0 %v2146_v48 }
 0x49d   : > { %v885_v55 = vmul.f32 %v2081_v54, %v2371_v19 }
 0x49f   : > { %v891_v57 = vpack.c.bf16 %v886_v56, %v885_v55 }
 0x4a0   : > { %v2083_v62 = vpop.eup %2082 }
 0x4a1   : > { %v883_v0 = vmul.f32 %v2083_v62, %v2375_v23 }
 0x4a2   : > { %1933 = vmatmul.mubr.msk.bf16.vlgmr.msra.gmra.mxu0 %vm603_vm2, %v891_v57 }
 0x4a3   : > { %1944 = vmatprep.mubr.msk.bf16.mxu0 %vm2147_vm1, %v2146_v48 }
 0x4c7   : > { %v869_v58 = vpop.xlane.xlu0 %868  ;;  %v860_v49 = vpop.xlane.xlu1 %859 }
 0x4c8   : > { %2084 = vrcp.f32 %v860_v49 }
 0x4c9   : > { %2086 = vrcp.f32 %v869_v58 }
 0x4cb   : > { %v1091_v59 = vpop.permute.xlu0 %1090  ;;  %v1142_v5 = vpop.permute.xlu1 %1141 }
 0x4cc   : > { %v1096_v60 = vsel %vm603_vm2, %v1091_v59, 0  ;;  %v1147_v18 = vsel %vm603_vm2, %v1142_v5, 0 }
 0x4cd   : > { %1943 = vmatpush3.bf16.xpose.msra.mxu0 %v1096_v60 }
 0x4ce   : > { %1954 = vmatprep.subr.bf16.mxu0 %v2146_v48 }
 0x4cf   : > { %v1089_v61 = vpop.permute.xlu0 %1088 }
 0x4d3   : > { %v1140_v9 = vpop.permute.xlu0 %1139 }
 0x4d4   : > { %1945 = vmatmul.mubr.msk.bf16.vlgmr.msra.gmra.mxu0 %vm603_vm2, %v1089_v61 }
 0x4d5   : > { %1956 = vmatprep.mubr.msk.bf16.mxu0 %vm2147_vm1, %v2146_v48  ;;  %v2085_v63 = vpop.eup %2084 }
 0x4d6   : > { %v884_v2 = vmul.f32 %v2085_v63, %v2384_v32  ;;  %v2087_v10 = vpop.eup %2086 }
 0x4d7   : > { %v1191_v12 = vpop.permute.xlu0 %1190  ;;  %v887_v15 = vmul.f32 %v2087_v10, %v2386_v33 }
 0x4d8   : > { %v890_v3 = vpack.c.bf16 %v884_v2, %v883_v0 }
 0x4da   : > { %1927 = vmatmul.mubr.msk.bf16.vlgmr.msra.gmra.mxu1 %vm603_vm2, %v890_v3 }
 0x4db   : > { %1937 = vmatpush3.bf16.msra.mxu1 %v1035_v39  ;;  %1938 = vmatprep.mubr.msk.bf16.mxu1 %vm2147_vm1, %v2146_v48 }
 0x4dc   : > { %1948 = vmatprep.subr.bf16.mxu1 %v2146_v48 }
 0x4fc   : > { %v872_v6 = vpop.xlane.xlu1 %871 }
 0x4fd   : > { %2088 = vrcp.f32 %v872_v6 }
 0x500   : > { %v1193_v7 = vpop.permute.xlu1 %1192 }
 0x501   : > { %v1198_v8 = vsel %vm603_vm2, %v1193_v7, 0 }
 0x502   : > { %1955 = vmatpush3.bf16.xpose.msra.mxu0 %v1198_v8 }
 0x503   : > { %1966 = vmatprep.subr.bf16.mxu0 %v2146_v48 }
 0x504   : > { %v1244_v19 = vpop.permute.xlu1 %1243 }
 0x505   : > { %v1249_v22 = vsel %vm603_vm2, %v1244_v19, 0 }
 0x508   : > { %v1242_v23 = vpop.permute.xlu1 %1241 }
 0x509   : > { %1957 = vmatmul.mubr.msk.bf16.vlgmr.msra.gmra.mxu0 %vm603_vm2, %v1191_v12 }
 0x50a   : > { %v2089_v14 = vpop.eup %2088  ;;  %1968 = vmatprep.mubr.msk.bf16.mxu0 %vm2147_vm1, %v2146_v48 }
 0x50b   : > { %v888_v16 = vmul.f32 %v2089_v14, %v2398_v40 }
 0x50d   : > { %v892_v17 = vpack.c.bf16 %v888_v16, %v887_v15 }
 0x50f   : > { %1939 = vmatmul.mubr.msk.bf16.vlgmr.msra.gmra.mxu1 %vm603_vm2, %v892_v17 }
 0x510   : > { %1949 = vmatpush3.bf16.xpose.msra.mxu1 %v1147_v18  ;;  %1950 = vmatprep.mubr.msk.bf16.mxu1 %vm2147_vm1, %v2146_v48 }
 0x511   : > { %1960 = vmatprep.subr.bf16.mxu1 %v2146_v48 }
 0x517   : > { %1951 = vmatmul.mubr.msk.bf16.vlgmr.msra.gmra.mxu1 %vm603_vm2, %v1140_v9 }
 0x518   : > { %1961 = vmatpush3.bf16.xpose.msra.mxu1 %v1249_v22  ;;  %1962 = vmatprep.mubr.msk.bf16.mxu1 %vm2147_vm1, %v2146_v48 }
 0x519   : > { %1972 = vmatprep.subr.bf16.mxu1 %v2146_v48 }
 0x51f   : > { %1963 = vmatmul.mubr.msk.bf16.vlgmr.msra.gmra.mxu1 %vm603_vm2, %v1242_v23 }
 0x520   : > { %1974 = vmatprep.mubr.msk.bf16.mxu1 %vm2147_vm1, %v2146_v48 }
 0x55a   : > { %v2448_v24 = vpop.f32.mrf.mxu0 }
 0x55c   : > { %v1922_v25 = vpop.f32.mrf.mxu0 }
 0x55e   : > { %v2450_v26 = vpop.f32.mrf.mxu0 }
 0x55f   : > { %v1081_v27 = vpack.c.bf16 %v2450_v26, %v2448_v24 }
 0x560   : > { %v1923_v30 = vpop.f32.mrf.mxu0 }
 0x562   : > { %v2454_v31 = vpop.f32.mrf.mxu0 }
 0x564   : > { %v1934_v32 = vpop.f32.mrf.mxu0 }
 0x566   : > { %v2456_v33 = vpop.f32.mrf.mxu0 }
 0x567   : > { %v1083_v20 = vpack.c.bf16 %v2456_v33, %v2454_v31 }
 0x568   : > { %v1935_v34 = vpop.f32.mrf.mxu0 }
 0x594   : > { %v1132_v36 = vpop.f32.mrf.mxu0 }
 0x595   : > { %v1133_v37 = vadd.f32 %v1817_v35, %v1132_v36 }
 0x596   : > { %v1946_v40 = vpop.f32.mrf.mxu0 }
 0x597   : > { %v1292_v28 = vsel %vm603_vm2, %v1133_v37, -inf }
 0x598   : > { %1293 = vmax.xlane.f32.xlu0 %v1292_v28  ;;  %v1135_v42 = vpop.f32.mrf.mxu0 }
 0x599   : > { %v1136_v43 = vadd.f32 %v1818_v41, %v1135_v42 }
 0x59a   : > { %v1947_v44 = vpop.f32.mrf.mxu0  ;;  %v2467_v21 = vpop.f32.mrf.mxu1 }
 0x59b   : > { %v1295_v45 = vsel %vm603_vm2, %v1136_v43, -inf }
 0x59c   : > { %1296 = vmax.xlane.f32.xlu1 %v1295_v45  ;;  %v1928_v46 = vpop.f32.mrf.mxu1 }
 0x59e   : > { %v2470_v47 = vpop.f32.mrf.mxu1 }
 0x59f   : > { %v1082_v50 = vpack.c.bf16 %v2470_v47, %v2467_v21 }
 0x5a0   : > { %v1929_v51 = vpop.f32.mrf.mxu1 }
 0x5c9   : > { %v1234_v29 = vpop.f32.mrf.mxu0 }
 0x5ca   : > { %v1235_v3 = vadd.f32 %v1817_v35, %v1234_v29 }
 0x5cb   : > { %v1958_v38 = vpop.f32.mrf.mxu0 }
 0x5cc   : > { %v1304_v9 = vsel %vm603_vm2, %v1235_v3, -inf }
 0x5cd   : > { %v1237_v52 = vpop.f32.mrf.mxu0 }
 0x5ce   : > { %v1238_v53 = vadd.f32 %v1818_v41, %v1237_v52 }
 0x5cf   : > { %v2474_v54 = vpop.f32.mrf.mxu1  ;;  %v1959_v55 = vpop.f32.mrf.mxu0 }
 0x5d0   : > { %v1307_v56 = vsel %vm603_vm2, %v1238_v53, -inf }
 0x5d1   : > { %1308 = vmax.xlane.f32.xlu1 %v1307_v56  ;;  %v1940_v57 = vpop.f32.mrf.mxu1 }
 0x5d3   : > { %v2477_v39 = vpop.f32.mrf.mxu1 }
 0x5d4   : > { %v1084_v58 = vpack.c.bf16 %v2477_v39, %v2474_v54 }
 0x5d5   : > { %v1941_v49 = vpop.f32.mrf.mxu1 }
 0x5d7   : > { %v1183_v59 = vpop.f32.mrf.mxu1 }
 0x5d8   : > { %v1184_v60 = vadd.f32 %v1817_v35, %v1183_v59 }
 0x5d9   : > { %v1952_v61 = vpop.f32.mrf.mxu1 }
 0x5da   : > { %v1298_v62 = vsel %vm603_vm2, %v1184_v60, -inf }
 0x5db   : > { %1299 = vmax.xlane.f32.xlu0 %v1298_v62  ;;  %v1186_v63 = vpop.f32.mrf.mxu1 }
 0x5dc   : > { %v1187_v0 = vadd.f32 %v1818_v41, %v1186_v63 }
 0x5dd   : > { %v1953_v2 = vpop.f32.mrf.mxu1 }
 0x5de   : > { %v1301_v5 = vsel %vm603_vm2, %v1187_v0, -inf }
 0x5df   : > { %1302 = vmax.xlane.f32.xlu0 %v1301_v5  ;;  %v1285_v6 = vpop.f32.mrf.mxu1 }
 0x5e0   : > { %v1286_v8 = vadd.f32 %v1817_v35, %v1285_v6 }
 0x5e1   : > { %v1964_v7 = vpop.f32.mrf.mxu1 }
 0x5e2   : > { %v1310_v15 = vsel %vm603_vm2, %v1286_v8, -inf }
 0x5e3   : > { %1305 = vmax.xlane.f32.xlu0 %v1304_v9  ;;  %v1288_v10 = vpop.f32.mrf.mxu1 }
 0x5e4   : > { %v1289_v12 = vadd.f32 %v1818_v41, %v1288_v10 }
 0x5e5   : > { %v1965_v14 = vpop.f32.mrf.mxu1 }
 0x5e6   : > { %v1313_v16 = vsel %vm603_vm2, %v1289_v12, -inf }
 0x5e7   : > { %1311 = vmax.xlane.f32.xlu0 %v1310_v15  ;;  %1314 = vmax.xlane.f32.xlu1 %v1313_v16 }
 0x621   : > { %v1294_v17 = vpop.xlane.xlu0 %1293 }
 0x622   : > { %v1316_v18 = vsub.f32 %v1133_v37, %v1294_v17 }
 0x624   : > { %v1324_v19 = vmul.f32 1.442695, %v1316_v18 }
 0x625   : > { %v1297_v22 = vpop.xlane.xlu1 %1296 }
 0x626   : > { %2090 = vpow2.f32 %v1324_v19  ;;  %v1317_v23 = vsub.f32 %v1136_v43, %v1297_v22 }
 0x628   : > { %v1326_v25 = vmul.f32 1.442695, %v1317_v23 }
 0x62a   : > { %2092 = vpow2.f32 %v1326_v25 }
 0x633   : > { %v2486_v30 = vpop.eup %2090 }
 0x634   : > { %v1340_v32 = vsel %vm603_vm2, %v2486_v30, 0.0 }
 0x635   : > { %1341 = vadd.xlane.f32.xlu0 %v1340_v32 }
 0x637   : > { %v2490_v34 = vpop.eup %2092 }
 0x638   : > { %v1343_v35 = vsel %vm603_vm2, %v2490_v34, 0.0 }
 0x639   : > { %1344 = vadd.xlane.f32.xlu1 %v1343_v35 }
 0x65a   : > { %v1309_v36 = vpop.xlane.xlu1 %1308 }
 0x65b   : > { %v1321_v41 = vsub.f32 %v1238_v53, %v1309_v36 }
 0x65d   : > { %v1334_v44 = vmul.f32 1.442695, %v1321_v41 }
 0x664   : > { %v1300_v37 = vpop.xlane.xlu0 %1299 }
 0x665   : > { %v1318_v40 = vsub.f32 %v1184_v60, %v1300_v37 }
 0x667   : > { %v1328_v28 = vmul.f32 1.442695, %v1318_v40 }
 0x668   : > { %v1303_v42 = vpop.xlane.xlu0 %1302 }
 0x669   : > { %2094 = vpow2.f32 %v1328_v28  ;;  %v1319_v43 = vsub.f32 %v1187_v0, %v1303_v42 }
 0x66b   : > { %v1330_v45 = vmul.f32 1.442695, %v1319_v43 }
 0x66c   : > { %v1306_v46 = vpop.xlane.xlu0 %1305 }
 0x66d   : > { %2096 = vpow2.f32 %v1330_v45  ;;  %v1320_v51 = vsub.f32 %v1235_v3, %v1306_v46 }
 0x66e   : > { %2098 = vpow2.f32 %v1334_v44 }
 0x66f   : > { %v1332_v29 = vmul.f32 1.442695, %v1320_v51 }
 0x670   : > { %v1312_v38 = vpop.xlane.xlu0 %1311  ;;  %v1315_v2 = vpop.xlane.xlu1 %1314 }
 0x671   : > { %2100 = vpow2.f32 %v1332_v29  ;;  %v1322_v52 = vsub.f32 %v1286_v8, %v1312_v38  ;;  %v1323_v3 = vsub.f32 %v1289_v12, %v1315_v2  ;;  %v2041_v29 = vld [vmem:[%s2577_s6] sm:$0xff]  }
 0x673   : > { %v1336_v55 = vmul.f32 1.442695, %v1322_v52  ;;  %v1338_v5 = vmul.f32 1.442695, %v1323_v3 }
 0x675   : > { %2102 = vpow2.f32 %v1336_v55 }
 0x676   : > { %v2095_v56 = vpop.eup %2094  ;;  %2104 = vpow2.f32 %v1338_v5 }
 0x677   : > { %v1346_v57 = vsel %vm603_vm2, %v2095_v56, 0.0 }
 0x678   : > { %1347 = vadd.xlane.f32.xlu0 %v1346_v57 }
 0x67a   : > { %v2097_v53 = vpop.eup %2096 }
 0x67b   : > { %v1349_v49 = vsel %vm603_vm2, %v2097_v53, 0.0  ;;  %v2099_v59 = vpop.eup %2098 }
 0x67c   : > { %1350 = vadd.xlane.f32.xlu1 %v1349_v49  ;;  %v1355_v62 = vsel %vm603_vm2, %v2099_v59, 0.0 }
 0x67e   : > { %v2101_v60 = vpop.eup %2100 }
 0x67f   : > { %v1352_v61 = vsel %vm603_vm2, %v2101_v60, 0.0 }
 0x680   : > { %1353 = vadd.xlane.f32.xlu0 %v1352_v61  ;;  %1356 = vadd.xlane.f32.xlu1 %v1355_v62 }
 0x682   : > { %v2498_v63 = vpop.eup %2102 }
 0x683   : > { %v1358_v0 = vsel %vm603_vm2, %v2498_v63, 0.0  ;;  %v2105_v6 = vpop.eup %2104 }
 0x684   : > { %1359 = vadd.xlane.f32.xlu0 %v1358_v0  ;;  %v1361_v7 = vsel %vm603_vm2, %v2105_v6, 0.0 }
 0x691   : > { %1431 = vrot.lane.b32.xlu1 %v2306_v1, %s2152_s18 }
 0x695   : > { %1478 = vrot.lane.b32.xlu1 %v2312_v11, %s2152_s18 }
 0x69a   : > { %1384 = vrot.lane.b32.xlu0 %v2308_v4, %s2152_s18 }
 0x6b9   : > { %1362 = vadd.xlane.f32.xlu1 %v1361_v7 }
 0x6be   : > { %v1342_v9 = vpop.xlane.xlu0 %1341 }
 0x6c2   : > { %v1345_v8 = vpop.xlane.xlu1 %1344 }
 0x6c3   : > { %2106 = vrcp.f32 %v1345_v8 }
 0x6c4   : > { %2108 = vrcp.f32 %v1342_v9 }
 0x6ca   : > { %1525 = vrot.lane.b32.xlu1 %v2315_v13, %s2152_s18 }
 0x6d0   : > { %v2107_v12 = vpop.eup %2106 }
 0x6d1   : > { %v2109_v16 = vpop.eup %2108  ;;  %v1373_v17 = vmul.f32 %v2107_v12, %v2490_v34 }
 0x6d2   : > { %v1372_v19 = vmul.f32 %v2109_v16, %v2486_v30 }
 0x6d4   : > { %v1380_v23 = vpack.c.bf16 %v1373_v17, %v1372_v19 }
 0x701   : > { %v1348_v10 = vpop.xlane.xlu0 %1347 }
 0x702   : > { %2110 = vrcp.f32 %v1348_v10 }
 0x705   : > { %v1351_v1 = vpop.xlane.xlu1 %1350 }
 0x706   : > { %2112 = vrcp.f32 %v1351_v1 }
 0x709   : > { %v1354_v11 = vpop.xlane.xlu0 %1353  ;;  %v1357_v4 = vpop.xlane.xlu1 %1356 }
 0x70a   : > { %2114 = vrcp.f32 %v1354_v11 }
 0x70b   : > { %2116 = vrcp.f32 %v1357_v4 }
 0x70d   : > { %v1360_v14 = vpop.xlane.xlu0 %1359  ;;  %v1432_v15 = vpop.permute.xlu1 %1431 }
 0x70e   : > { %1973 = vmatpush3.bf16.msra.mxu1 %v1432_v15  ;;  %2118 = vrcp.f32 %v1360_v14 }
 0x70f   : > { %1984 = vmatprep.subr.bf16.mxu1 %v2146_v48  ;;  %v2111_v13 = vpop.eup %2110 }
 0x710   : > { %v1374_v25 = vmul.f32 %v2111_v13, %v2095_v56 }
 0x711   : > { %v1385_v18 = vpop.permute.xlu0 %1384  ;;  %v1479_v35 = vpop.permute.xlu1 %1478 }
 0x712   : > { %1967 = vmatpush3.bf16.msra.mxu0 %v1385_v18 }
 0x713   : > { %v2113_v22 = vpop.eup %2112  ;;  %1978 = vmatprep.subr.bf16.mxu0 %v2146_v48 }
 0x714   : > { %v1375_v32 = vmul.f32 %v2113_v22, %v2097_v53 }
 0x715   : > { %1969 = vmatmul.mubr.msk.bf16.vlgmr.msra.gmra.mxu0 %vm603_vm2, %v1380_v23 }
 0x716   : > { %1979 = vmatpush3.bf16.msra.mxu0 %v1479_v35  ;;  %v1381_v36 = vpack.c.bf16 %v1375_v32, %v1374_v25  ;;  %1980 = vmatprep.mubr.msk.bf16.mxu0 %vm2147_vm1, %v2146_v48 }
 0x717   : > { %v2115_v34 = vpop.eup %2114 }
 0x718   : > { %v2117_v37 = vpop.eup %2116  ;;  %1975 = vmatmul.mubr.msk.bf16.vlgmr.msra.gmra.mxu1 %vm603_vm2, %v1381_v36  ;;  %v1376_v30 = vmul.f32 %v2115_v34, %v2101_v60 }
 0x719   : > { %v1377_v40 = vmul.f32 %v2117_v37, %v2099_v59  ;;  %1986 = vmatprep.mubr.msk.bf16.mxu1 %vm2147_vm1, %v2146_v48  ;;  %v2040_v48 = vld [vmem:[%s2577_s6 + $0x8] sm:$0xff]  }
 0x71a   : > { %1990 = vmatprep.subr.bf16.mxu0 %v2040_v48 }
 0x71b   : > { %v1382_v41 = vpack.c.bf16 %v1377_v40, %v1376_v30  ;;  %v2119_v43 = vpop.eup %2118 }
 0x71c   : > { %v1378_v45 = vmul.f32 %v2119_v43, %v2498_v63 }
 0x71d   : > { %1981 = vmatmul.mubr.msk.bf16.vlgmr.msra.gmra.mxu0 %vm603_vm2, %v1382_v41 }
 0x71e   : > { %1991 = vmatpush3.bf16.msra.mxu0 %v2040_v48 }
 0x71f   : > { %1992 = vmatprep.subr.bf16.mxu0 %v2041_v29 }
 0x722   : > { %1993 = vmatpush3.bf16.msra.mxu0 %v2041_v29 }
 0x742   : > { %v1363_v28 = vpop.xlane.xlu1 %1362 }
 0x743   : > { %2120 = vrcp.f32 %v1363_v28 }
 0x746   : > { %v1526_v42 = vpop.permute.xlu1 %1525 }
 0x747   : > { %1985 = vmatpush3.bf16.msra.mxu1 %v1526_v42 }
 0x750   : > { %v2121_v44 = vpop.eup %2120 }
 0x751   : > { %v1379_v46 = vmul.f32 %v2121_v44, %v2105_v6 }
 0x753   : > { %v1383_v51 = vpack.c.bf16 %v1379_v46, %v1378_v45 }
 0x755   : > { %1987 = vmatmul.mubr.msk.bf16.vlgmr.msra.gmra.mxu1 %vm603_vm2, %v1383_v51 }
 0x7d5   : > { %v1424_v38 = vpop.f32.mrf.mxu0 }
 0x7d7   : > { %v1970_v52 = vpop.f32.mrf.mxu0 }
 0x7d8   : > { %v1471_v55 = vpop.f32.mrf.mxu1 }
 0x7d9   : > { %v1427_v56 = vpop.f32.mrf.mxu0 }
 0x7da   : > { %v1572_v57 = vpack.c.bf16 %v1427_v56, %v1424_v38  ;;  %v1976_v53 = vpop.f32.mrf.mxu1 }
 0x7db   : > { %v1971_v49 = vpop.f32.mrf.mxu0 }
 0x7dc   : > { %1580 = vrot.lane.b32.xlu0 %v1572_v57, %s2153_s23  ;;  %v1474_v59 = vpop.f32.mrf.mxu1 }
 0x7dd   : > { %v1573_v60 = vpack.c.bf16 %v1474_v59, %v1471_v55  ;;  %v1518_v61 = vpop.f32.mrf.mxu0 }
 0x7de   : > { %v1977_v62 = vpop.f32.mrf.mxu1 }
 0x7df   : > { %v1982_v63 = vpop.f32.mrf.mxu0  ;;  %1582 = vrot.lane.b32.xlu1 %v1573_v60, %s2153_s23 }
 0x7e1   : > { %v1521_v0 = vpop.f32.mrf.mxu0 }
 0x7e2   : > { %v1574_v2 = vpack.c.bf16 %v1521_v0, %v1518_v61 }
 0x7e3   : > { %v1983_v3 = vpop.f32.mrf.mxu0 }
 0x7e4   : > { %1584 = vrot.lane.b32.xlu0 %v1574_v2, %s2153_s23 }
 0x815   : > { %v1565_v5 = vpop.f32.mrf.mxu1 }
 0x817   : > { %v1988_v6 = vpop.f32.mrf.mxu1 }
 0x819   : > { %v1568_v7 = vpop.f32.mrf.mxu1 }
 0x81a   : > { %v1575_v8 = vpack.c.bf16 %v1568_v7, %v1565_v5 }
 0x81b   : > { %v1989_v9 = vpop.f32.mrf.mxu1 }
 0x81c   : > { %1586 = vrot.lane.b32.xlu1 %v1575_v8, %s2153_s23 }
 0x84e   : > { %v1581_v10 = vpop.permute.xlu0 %1580 }
 0x84f   : > { %v1590_v1 = vsel %vm603_vm2, %v1081_v27, %v1581_v10  ;;  %v1827_v27 = vld [vmem:[%s2578_s7] ss:$0 sm:$0xff] }
 0x850   : > { %1994 = vmatprep.mubr.msk.bf16.mxu0 %vm354_vm0, %v1590_v1 }
 0x851   : > { %v1583_v11 = vpop.permute.xlu1 %1582 }
 0x852   : > { %v1593_v4 = vsel %vm603_vm2, %v1082_v50, %v1583_v11 }
 0x853   : > { %1995 = vmatmul.mubr.msk.bf16.vlgmr.msra.gmra.mxu0 %vm354_vm0, %v1593_v4 }
 0x856   : > { %v1585_v12 = vpop.permute.xlu0 %1584 }
 0x857   : > { %v1596_v14 = vsel %vm603_vm2, %v1083_v20, %v1585_v12 }
 0x858   : > { %1998 = vmatprep.mubr.msk.bf16.mxu0 %vm354_vm0, %v1596_v14 }
 0x88e   : > { %v1587_v24 = vpop.permute.xlu1 %1586 }
 0x88f   : > { %v1599_v26 = vsel %vm603_vm2, %v1084_v58, %v1587_v24 }
 0x890   : > { %1999 = vmatmul.mubr.msk.bf16.gmra.mxu0 %vm354_vm0, %v1599_v26 }
 0x913   : > { %v1996_v31 = vpop.f32.mrf.mxu0 }
 0x914   : > { %v1674_v33 = vadd.f32 %v1996_v31, %v1827_v27 }
 0x915   : > { %v1665_v20 = vpop.f32.mrf.mxu0 }
 0x916   : > { %1698 = vst.msk [vmem:[%s343_s11 + $0x10] sm:$0xff] %vm354_vm0, %v1674_v33  ;;  %v1666_v21 = vadd.f32 %v1827_v27, %v1665_v20 }
 0x917   : > { %v1997_v47 = vpop.f32.mrf.mxu0 }
 0x918   : > { %1696 = vst.msk [vmem:[%s343_s11] sm:$0xff] %vm354_vm0, %v1666_v21  ;;  %v1677_v50 = vadd.f32 %v1997_v47, %v1827_v27 }
 0x919   : > { %v1668_v54 = vpop.f32.mrf.mxu0 }
 0x91a   : > { %1699 = vst.msk [vmem:[%s343_s11 + $0x18] sm:$0xff] %vm354_vm0, %v1677_v50  ;;  %v1669_v39 = vadd.f32 %v1827_v27, %v1668_v54 }
 0x91c   : > { %1697 = vst.msk [vmem:[%s343_s11 + $0x8] sm:$0xff] %vm354_vm0, %v1669_v39 }
 0x950   : > { %v2000_v58 = vpop.f32.mrf.mxu0 }
 0x951   : > { %v1690_v15 = vadd.f32 %v2000_v58, %v1827_v27 }
 0x952   : > { %v1681_v16 = vpop.f32.mrf.mxu0 }
 0x953   : > { %1702 = vst.msk [vmem:[%s343_s11 + $0x30] sm:$0xff] %vm354_vm0, %v1690_v15  ;;  %v1682_v17 = vadd.f32 %v1827_v27, %v1681_v16 }
 0x954   : > { %v2001_v13 = vpop.f32.mrf.mxu0 }
 0x955   : > { %1700 = vst.msk [vmem:[%s343_s11 + $0x20] sm:$0xff] %vm354_vm0, %v1682_v17  ;;  %v1693_v18 = vadd.f32 %v2001_v13, %v1827_v27 }
 0x956   : > { %v1684_v19 = vpop.f32.mrf.mxu0 }
 0x957   : > { %1703 = vst.msk [vmem:[%s343_s11 + $0x38] sm:$0xff] %vm354_vm0, %v1693_v18  ;;  %v1685_v22 = vadd.f32 %v1827_v27, %v1684_v19 }
 0x959   : > { %1701 = vst.msk [vmem:[%s343_s11 + $0x28] sm:$0xff] %vm354_vm0, %v1685_v22 }
 0x95a PF: > { %s18_s29 = sadd.s32 1, %s2144_s29   ;;  %s2580_s27 = smov %s2140_s28 }
 0x95b   : > { %p15_p5 = scmp.ge.s32.totalorder %s18_s29, 4   ;;  %s2581_s28 = smov %s2583_s30 }
 0x95d   :  { %17 = sbr.rel (!%p15_p5) target bundleno = 2 (0x2), region = 83 }

</bundles_post_ra>
